<compile_context>
chip_gen: v5e
topology: v5e:2x2
jax: 0.10.0
libtpu: 0.0.40
codegen_flags: <defaults>
</compile_context>

<pallas_src>
import functools

import jax
import jax.numpy as jnp
from jax import lax
from jax.experimental import pallas as pl
from jax.experimental.pallas import tpu as pltpu


# ----------------------------------------------------------------------------
# Generation-aware VMEM budget and constant-block specs.
# ----------------------------------------------------------------------------
@functools.lru_cache(maxsize=None)
def _vmem_limit_bytes():
    """~3/4 of physical VMEM (v7x: 64 MiB, v5e/v6e: 128 MiB), never below the
    32 MiB scoped default, capped at 96 MiB."""
    try:
        cap = int(pltpu.get_tpu_info().vmem_capacity_bytes)
    except Exception:  # query unavailable -> conservative (v7x-sized) fallback
        cap = 64 * 1024 * 1024
    return max(32 * 1024 * 1024, min((cap * 3) // 4, 96 * 1024 * 1024))


def _weight_spec(block_shape, index_map, single_buffer):
    """BlockSpec for grid-constant weights/biases.  Single-buffering them frees
    VMEM (the block never changes, so double-buffering only duplicates it)."""
    if single_buffer:
        return pl.BlockSpec(block_shape, index_map, pipeline_mode=pl.Buffered(1))
    return pl.BlockSpec(block_shape, index_map)


# ----------------------------------------------------------------------------
# Kernel 1: QKV projection -> head-split (nh, M, D) q/k/v in bf16.
# Three full-width bf16 MXU matmuls (full output-lane utilization, f32 acc);
# the per-head split happens once here so the attention kernel never
# lane-slices q/k/v.
# ----------------------------------------------------------------------------
def _qkv_proj_kernel(x_ref, wq_ref, wk_ref, wv_ref, q_ref, k_ref, v_ref, *,
                     num_heads, head_dim):
    x = x_ref[...]  # (tm, C) bf16

    def matmul_split(w_ref, out_ref):
        acc = jnp.dot(x, w_ref[...], preferred_element_type=jnp.float32)  # (tm, C) f32
        for h in range(num_heads):  # static unroll: per-head (tm, D) stores
            out_ref[h] = acc[:, h * head_dim:(h + 1) * head_dim].astype(out_ref.dtype)

    matmul_split(wq_ref, q_ref)
    matmul_split(wk_ref, k_ref)
    matmul_split(wv_ref, v_ref)


def pallas_qkv_proj(x2d, wq, wk, wv, *, num_heads, head_dim, tm=1024,
                    single_buffer=True):
    """x2d: (M, C) bf16; wq/wk/wv: (C, C) bf16 (softmax scale already folded
    into wq).  Returns head-split q, k, v each of shape (num_heads, M, D)."""
    M, C = x2d.shape
    tm = min(tm, M)
    if tm < M:
        tm = max(8, (tm // 8) * 8)
    grid = (pl.cdiv(M, tm),)
    cost = pl.CostEstimate(
        flops=2 * M * C * 3 * C,
        transcendentals=0,
        bytes_accessed=2 * (M * C + 3 * C * C + 3 * M * C),
    )
    out_sds = jax.ShapeDtypeStruct((num_heads, M, head_dim), jnp.bfloat16)
    head_out_spec = pl.BlockSpec((num_heads, tm, head_dim), lambda i: (0, i, 0))
    w_spec = _weight_spec((C, C), lambda i: (0, 0), single_buffer)
    return pl.pallas_call(
        functools.partial(_qkv_proj_kernel, num_heads=num_heads, head_dim=head_dim),
        out_shape=(out_sds, out_sds, out_sds),
        grid=grid,
        in_specs=[pl.BlockSpec((tm, C), lambda i: (i, 0)), w_spec, w_spec, w_spec],
        out_specs=(head_out_spec, head_out_spec, head_out_spec),
        compiler_params=pltpu.CompilerParams(
            dimension_semantics=("parallel",),
            vmem_limit_bytes=_vmem_limit_bytes(),
        ),
        cost_estimate=cost,
    )(x2d, wq, wk, wv)


# ----------------------------------------------------------------------------
# Kernel 2: multi-head attention with the output projection fused into the
# epilogue.  All heads per grid step; per-head tiles are read with leading-axis
# indexing only (no lane slicing); one lane-dense (tq, C) store per step.
# ----------------------------------------------------------------------------
def _mha_proj_kernel(q_ref, k_ref, v_ref, pw_ref, pb_ref, o_ref, *, num_heads):
    acc = None
    for h in range(num_heads):          # static unroll over heads
        q_h = q_ref[h, 0]               # (tq, D) bf16; softmax scale pre-folded
        k_h = k_ref[h, 0]               # (Nk, D) bf16
        v_h = v_ref[h, 0]               # (Nk, D) bf16

        # q_h @ k_h^T without an in-kernel transpose: contract last dims.
        s = lax.dot_general(
            q_h, k_h,
            dimension_numbers=(((1,), (1,)), ((), ())),
            preferred_element_type=jnp.float32,
        )                                                     # (tq, Nk) f32

        m = jnp.max(s, axis=-1, keepdims=True)
        p = jnp.exp(s - m)
        l = jnp.sum(p, axis=-1, keepdims=True)                # (tq, 1) f32

        o_h = jnp.dot(p.astype(jnp.bfloat16), v_h,
                      preferred_element_type=jnp.float32)     # (tq, D) f32
        # Deferred softmax normalization on the small (tq, D) tile (EUP slot).
        o_h = o_h * pl.reciprocal(l, approx=True)

        # Fused output projection: fold this head straight into the (tq, C)
        # accumulator so its vregs die immediately (no concat epilogue).
        contrib = jnp.dot(o_h.astype(jnp.bfloat16), pw_ref[h],
                          preferred_element_type=jnp.float32)  # (tq, C) f32
        acc = contrib if acc is None else acc + contrib

    # Single unmasked lane-dense (tq, C) store.
    o_ref[0] = (acc + pb_ref[...]).astype(o_ref.dtype)


def pallas_mha_proj(q, k, v, pw, pb, out_dtype, *, tq=256, single_buffer=True):
    """q/k/v: (nh, B, N, D) bf16 head-split; pw: (nh, D, C) bf16 proj weight;
    pb: (1, C) f32 proj bias.  Returns proj(softmax(q k^T) v): (B, N, C)."""
    nh, B, N, D = q.shape
    Nk = k.shape[2]
    C = nh * D
    vmem_limit = _vmem_limit_bytes()

    # q-tile: as large as possible while one head's f32 score tile stays well
    # inside the generation's VMEM budget.
    score_cap = max(4 * 1024 * 1024, vmem_limit // 6)
    tq = min(tq, N)
    while tq > 8 and tq * Nk * 4 > score_cap:
        tq //= 2
    if tq < N:
        tq = max(8, (tq // 8) * 8)
    # v7x megacore: make sure a parallel axis has >= 2 steps.
    if B == 1 and N >= 16 and pl.cdiv(N, tq) < 2:
        tq = max(8, (N // 2 // 8) * 8)

    grid = (B, pl.cdiv(N, tq))
    cost = pl.CostEstimate(
        flops=4 * B * N * Nk * C + 2 * B * N * C * C,
        transcendentals=B * nh * N * Nk,
        bytes_accessed=2 * (B * N * C + 2 * B * Nk * C + nh * D * C) + 4 * B * N * C,
    )
    return pl.pallas_call(
        functools.partial(_mha_proj_kernel, num_heads=nh),
        out_shape=jax.ShapeDtypeStruct((B, N, C), out_dtype),
        grid=grid,
        in_specs=[
            pl.BlockSpec((nh, 1, tq, D), lambda b, i: (0, b, i, 0)),
            pl.BlockSpec((nh, 1, Nk, D), lambda b, i: (0, b, 0, 0)),
            pl.BlockSpec((nh, 1, Nk, D), lambda b, i: (0, b, 0, 0)),
            _weight_spec((nh, D, C), lambda b, i: (0, 0, 0), single_buffer),
            _weight_spec((1, C), lambda b, i: (0, 0), single_buffer),
        ],
        out_specs=pl.BlockSpec((1, tq, C), lambda b, i: (b, i, 0)),
        compiler_params=pltpu.CompilerParams(
            dimension_semantics=("parallel", "parallel"),
            vmem_limit_bytes=vmem_limit,
        ),
        cost_estimate=cost,
    )(q, k, v, pw, pb)


# ----------------------------------------------------------------------------
# Full forward (matches Attention.forward with qkv_bias=False, sr_ratio=1,
# attn_drop=proj_drop=0.0 — dropout is identity in eval / p=0).
# ----------------------------------------------------------------------------
def _attention_forward(x, H, W, params, num_heads, single_buffer_weights):
    del H, W  # only needed for the sr_ratio > 1 branch (not instantiated)
    B, N, C = x.shape
    D = C // num_heads
    scale = D ** -0.5
    M = B * N

    # bf16 MXU operands (f32 accumulation / softmax stats stay inside kernels).
    # Softmax scale folded into the q weights (trace-time constant fold).
    x_bf = x.astype(jnp.bfloat16).reshape(M, C)
    wq = (params["q_w_t"] * scale).astype(jnp.bfloat16)     # (C, C)
    wk = params["kv_w_t"][:, :C].astype(jnp.bfloat16)       # (C, C), k columns
    wv = params["kv_w_t"][:, C:].astype(jnp.bfloat16)       # (C, C), v columns
    pw = params["proj_w_t"].reshape(num_heads, D, C).astype(jnp.bfloat16)
    pb = params["proj_b"].reshape(1, C).astype(jnp.float32)

    q, k, v = pallas_qkv_proj(x_bf, wq, wk, wv, num_heads=num_heads, head_dim=D,
                              single_buffer=single_buffer_weights)
    # (nh, B*N, D) -> (nh, B, N, D): free row-major reshape, no HBM shuffle.
    q = q.reshape(num_heads, B, N, D)
    k = k.reshape(num_heads, B, N, D)
    v = v.reshape(num_heads, B, N, D)

    # Attention core with the output projection fused into its epilogue.
    return pallas_mha_proj(q, k, v, pw, pb, x.dtype,
                           single_buffer=single_buffer_weights)


def attention_forward(x, H, W, params, num_heads):
    try:
        return _attention_forward(x, H, W, params, num_heads, True)
    except Exception:
        # Graceful fallback if this JAX build rejects pipeline_mode=pl.Buffered(1)
        # on grid-constant weight blocks: rerun with default double buffering.
        return _attention_forward(x, H, W, params, num_heads, False)


# ----------------------------------------------------------------------------
# Pure-JAX f32 reference (mirrors the PyTorch forward) for the correctness check.
# ----------------------------------------------------------------------------
def attention_reference(x, params, num_heads):
    B, N, C = x.shape
    D = C // num_heads
    scale = D ** -0.5
    q = (x @ params["q_w_t"] + params["q_b"]).reshape(B, N, num_heads, D).transpose(0, 2, 1, 3)
    kv = (x @ params["kv_w_t"] + params["kv_b"]).reshape(B, N, 2, num_heads, D).transpose(2, 0, 3, 1, 4)
    k, v = kv[0], kv[1]
    attn = jnp.einsum("bhnd,bhmd->bhnm", q, k) * scale
    attn = jax.nn.softmax(attn, axis=-1)
    o = jnp.einsum("bhnm,bhmd->bhnd", attn, v).transpose(0, 2, 1, 3).reshape(B, N, C)
    return o @ params["proj_w_t"] + params["proj_b"]


def init_params(key, dim):
    """Deterministic init mirroring the module's _init_weights (trunc_normal
    std=0.02, zero biases).  Torch Linear weight is (out, in); we store the
    transpose (in, out)."""
    k1, k2, k3 = jax.random.split(key, 3)

    def trunc(k, shape):
        return jax.random.truncated_normal(k, -2.0, 2.0, shape, jnp.float32) * 0.02

    return {
        # qkv_bias=False -> zero biases for q/kv (identical to no bias)
        "q_w_t": trunc(k1, (dim, dim)),
        "q_b": jnp.zeros((dim,), jnp.float32),
        "kv_w_t": trunc(k2, (dim, 2 * dim)),
        "kv_b": jnp.zeros((2 * dim,), jnp.float32),
        "proj_w_t": trunc(k3, (dim, dim)),
        "proj_b": jnp.zeros((dim,), jnp.float32),
    }


if __name__ == "__main__":
    B, C = 2, 32
    num_heads = 2
    H = W = 8
    N = H * W

    key = jax.random.PRNGKey(0)
    kx, kp = jax.random.split(key)
    x = jax.random.normal(kx, (B, N, C), jnp.float32)
    params = init_params(kp, C)

    out = attention_forward(x, H, W, params, num_heads)
    out = jax.block_until_ready(out)

    ref = attention_reference(x, params, num_heads)
    assert out.shape == (B, N, C)
    # Tolerance accounts for bf16 MXU operands (rel ~2^-8 per cast, f32 accum)
    # and the approximate EUP reciprocal (~2^-12) in the softmax denominator.
    max_err = float(jnp.max(jnp.abs(out - ref)))
    assert jnp.allclose(out, ref, atol=2e-3, rtol=2e-2), (
        f"Pallas output mismatch vs reference (max abs err {max_err:.3e})")

    print("KERNEL_OK")
</pallas_src>

<mosaic_0001>
module attributes {stable_mosaic.version = 11 : i64} {
  func.func @_qkv_proj_kernel(%arg0: i32, %arg1: memref<128x32xbf16, #tpu.memory_space<vmem>>, %arg2: memref<32x32xbf16, #tpu.memory_space<vmem>>, %arg3: memref<32x32xbf16, #tpu.memory_space<vmem>>, %arg4: memref<32x32xbf16, #tpu.memory_space<vmem>>, %arg5: memref<2x128x16xbf16, #tpu.memory_space<vmem>>, %arg6: memref<2x128x16xbf16, #tpu.memory_space<vmem>>, %arg7: memref<2x128x16xbf16, #tpu.memory_space<vmem>>) attributes {dimension_semantics = [#tpu.dimension_semantics<parallel>], iteration_bounds = array<i64: 1>, scalar_prefetch = 0 : i64, scratch_operands = 0 : i64, tpu.core_type = #tpu.core_type<tc>, window_params = [{transform_indices = @transform_0, window_bounds = array<i64: 128, 32>}, {pipeline_mode = #tpu.pipeline_mode<synchronous>, transform_indices = @transform_1, window_bounds = array<i64: 32, 32>}, {pipeline_mode = #tpu.pipeline_mode<synchronous>, transform_indices = @transform_2, window_bounds = array<i64: 32, 32>}, {pipeline_mode = #tpu.pipeline_mode<synchronous>, transform_indices = @transform_3, window_bounds = array<i64: 32, 32>}, {transform_indices = @transform_4, window_bounds = array<i64: 2, 128, 16>}, {transform_indices = @transform_5, window_bounds = array<i64: 2, 128, 16>}, {transform_indices = @transform_6, window_bounds = array<i64: 2, 128, 16>}]} {
    %c0 = arith.constant 0 : index
    %c0_0 = arith.constant 0 : index
    %0 = vector.load %arg1[%c0, %c0_0] : memref<128x32xbf16, #tpu.memory_space<vmem>>, vector<128x32xbf16>
    %c0_1 = arith.constant 0 : index
    %c0_2 = arith.constant 0 : index
    %1 = vector.load %arg2[%c0_1, %c0_2] : memref<32x32xbf16, #tpu.memory_space<vmem>>, vector<32x32xbf16>
    %cst = arith.constant dense<0.000000e+00> : vector<128x32xf32>
    %2 = tpu.matmul %0, %1, %cst {dimension_numbers = #tpu.dot_dimension_numbers<[1], [0], [0], [1], [0, 0, 1, 1], [], []>} : vector<128x32xbf16>, vector<32x32xbf16>, vector<128x32xf32> -> vector<128x32xf32>
    %3 = vector.extract_strided_slice %2 {offsets = [0, 0], sizes = [128, 16], strides = [1, 1]} : vector<128x32xf32> to vector<128x16xf32>
    %4 = arith.truncf %3 : vector<128x16xf32> to vector<128x16xbf16>
    %c0_3 = arith.constant 0 : index
    %c0_4 = arith.constant 0 : index
    %c0_5 = arith.constant 0 : index
    %5 = vector.load %arg5[%c0_3, %c0_4, %c0_5] : memref<2x128x16xbf16, #tpu.memory_space<vmem>>, vector<1x128x16xbf16>
    %6 = vector.shape_cast %5 : vector<1x128x16xbf16> to vector<128x16xbf16>
    %7 = vector.shape_cast %4 : vector<128x16xbf16> to vector<1x128x16xbf16>
    tpu.vector_store %arg5[%c0_3, %c0_4, %c0_5], %7 {strides = array<i32>} : memref<2x128x16xbf16, #tpu.memory_space<vmem>>, vector<1x128x16xbf16>,
    %8 = vector.extract_strided_slice %2 {offsets = [0, 16], sizes = [128, 16], strides = [1, 1]} : vector<128x32xf32> to vector<128x16xf32>
    %9 = arith.truncf %8 : vector<128x16xf32> to vector<128x16xbf16>
    %c1 = arith.constant 1 : index
    %c0_6 = arith.constant 0 : index
    %c0_7 = arith.constant 0 : index
    %10 = vector.load %arg5[%c1, %c0_6, %c0_7] : memref<2x128x16xbf16, #tpu.memory_space<vmem>>, vector<1x128x16xbf16>
    %11 = vector.shape_cast %10 : vector<1x128x16xbf16> to vector<128x16xbf16>
    %12 = vector.shape_cast %9 : vector<128x16xbf16> to vector<1x128x16xbf16>
    tpu.vector_store %arg5[%c1, %c0_6, %c0_7], %12 {strides = array<i32>} : memref<2x128x16xbf16, #tpu.memory_space<vmem>>, vector<1x128x16xbf16>,
    %c0_8 = arith.constant 0 : index
    %c0_9 = arith.constant 0 : index
    %13 = vector.load %arg3[%c0_8, %c0_9] : memref<32x32xbf16, #tpu.memory_space<vmem>>, vector<32x32xbf16>
    %cst_10 = arith.constant dense<0.000000e+00> : vector<128x32xf32>
    %14 = tpu.matmul %0, %13, %cst_10 {dimension_numbers = #tpu.dot_dimension_numbers<[1], [0], [0], [1], [0, 0, 1, 1], [], []>} : vector<128x32xbf16>, vector<32x32xbf16>, vector<128x32xf32> -> vector<128x32xf32>
    %15 = vector.extract_strided_slice %14 {offsets = [0, 0], sizes = [128, 16], strides = [1, 1]} : vector<128x32xf32> to vector<128x16xf32>
    %16 = arith.truncf %15 : vector<128x16xf32> to vector<128x16xbf16>
    %c0_11 = arith.constant 0 : index
    %c0_12 = arith.constant 0 : index
    %c0_13 = arith.constant 0 : index
    %17 = vector.load %arg6[%c0_11, %c0_12, %c0_13] : memref<2x128x16xbf16, #tpu.memory_space<vmem>>, vector<1x128x16xbf16>
    %18 = vector.shape_cast %17 : vector<1x128x16xbf16> to vector<128x16xbf16>
    %19 = vector.shape_cast %16 : vector<128x16xbf16> to vector<1x128x16xbf16>
    tpu.vector_store %arg6[%c0_11, %c0_12, %c0_13], %19 {strides = array<i32>} : memref<2x128x16xbf16, #tpu.memory_space<vmem>>, vector<1x128x16xbf16>,
    %20 = vector.extract_strided_slice %14 {offsets = [0, 16], sizes = [128, 16], strides = [1, 1]} : vector<128x32xf32> to vector<128x16xf32>
    %21 = arith.truncf %20 : vector<128x16xf32> to vector<128x16xbf16>
    %c1_14 = arith.constant 1 : index
    %c0_15 = arith.constant 0 : index
    %c0_16 = arith.constant 0 : index
    %22 = vector.load %arg6[%c1_14, %c0_15, %c0_16] : memref<2x128x16xbf16, #tpu.memory_space<vmem>>, vector<1x128x16xbf16>
    %23 = vector.shape_cast %22 : vector<1x128x16xbf16> to vector<128x16xbf16>
    %24 = vector.shape_cast %21 : vector<128x16xbf16> to vector<1x128x16xbf16>
    tpu.vector_store %arg6[%c1_14, %c0_15, %c0_16], %24 {strides = array<i32>} : memref<2x128x16xbf16, #tpu.memory_space<vmem>>, vector<1x128x16xbf16>,
    %c0_17 = arith.constant 0 : index
    %c0_18 = arith.constant 0 : index
    %25 = vector.load %arg4[%c0_17, %c0_18] : memref<32x32xbf16, #tpu.memory_space<vmem>>, vector<32x32xbf16>
    %cst_19 = arith.constant dense<0.000000e+00> : vector<128x32xf32>
    %26 = tpu.matmul %0, %25, %cst_19 {dimension_numbers = #tpu.dot_dimension_numbers<[1], [0], [0], [1], [0, 0, 1, 1], [], []>} : vector<128x32xbf16>, vector<32x32xbf16>, vector<128x32xf32> -> vector<128x32xf32>
    %27 = vector.extract_strided_slice %26 {offsets = [0, 0], sizes = [128, 16], strides = [1, 1]} : vector<128x32xf32> to vector<128x16xf32>
    %28 = arith.truncf %27 : vector<128x16xf32> to vector<128x16xbf16>
    %c0_20 = arith.constant 0 : index
    %c0_21 = arith.constant 0 : index
    %c0_22 = arith.constant 0 : index
    %29 = vector.load %arg7[%c0_20, %c0_21, %c0_22] : memref<2x128x16xbf16, #tpu.memory_space<vmem>>, vector<1x128x16xbf16>
    %30 = vector.shape_cast %29 : vector<1x128x16xbf16> to vector<128x16xbf16>
    %31 = vector.shape_cast %28 : vector<128x16xbf16> to vector<1x128x16xbf16>
    tpu.vector_store %arg7[%c0_20, %c0_21, %c0_22], %31 {strides = array<i32>} : memref<2x128x16xbf16, #tpu.memory_space<vmem>>, vector<1x128x16xbf16>,
    %32 = vector.extract_strided_slice %26 {offsets = [0, 16], sizes = [128, 16], strides = [1, 1]} : vector<128x32xf32> to vector<128x16xf32>
    %33 = arith.truncf %32 : vector<128x16xf32> to vector<128x16xbf16>
    %c1_23 = arith.constant 1 : index
    %c0_24 = arith.constant 0 : index
    %c0_25 = arith.constant 0 : index
    %34 = vector.load %arg7[%c1_23, %c0_24, %c0_25] : memref<2x128x16xbf16, #tpu.memory_space<vmem>>, vector<1x128x16xbf16>
    %35 = vector.shape_cast %34 : vector<1x128x16xbf16> to vector<128x16xbf16>
    %36 = vector.shape_cast %33 : vector<128x16xbf16> to vector<1x128x16xbf16>
    tpu.vector_store %arg7[%c1_23, %c0_24, %c0_25], %36 {strides = array<i32>} : memref<2x128x16xbf16, #tpu.memory_space<vmem>>, vector<1x128x16xbf16>,
    return
  }
  func.func @transform_0(%arg0: i32) -> (i32, i32) {
    %c0_i32 = arith.constant 0 : i32
    %c0_i32_0 = arith.constant 0 : i32
    return %arg0, %c0_i32 : i32, i32
  }
  func.func @transform_1(%arg0: i32) -> (i32, i32) {
    %c0_i32 = arith.constant 0 : i32
    %c0_i32_0 = arith.constant 0 : i32
    %c0_i32_1 = arith.constant 0 : i32
    return %c0_i32, %c0_i32_0 : i32, i32
  }
  func.func @transform_2(%arg0: i32) -> (i32, i32) {
    %c0_i32 = arith.constant 0 : i32
    %c0_i32_0 = arith.constant 0 : i32
    %c0_i32_1 = arith.constant 0 : i32
    return %c0_i32, %c0_i32_0 : i32, i32
  }
  func.func @transform_3(%arg0: i32) -> (i32, i32) {
    %c0_i32 = arith.constant 0 : i32
    %c0_i32_0 = arith.constant 0 : i32
    %c0_i32_1 = arith.constant 0 : i32
    return %c0_i32, %c0_i32_0 : i32, i32
  }
  func.func @transform_4(%arg0: i32) -> (i32, i32, i32) {
    %c0_i32 = arith.constant 0 : i32
    %c0_i32_0 = arith.constant 0 : i32
    %c0_i32_1 = arith.constant 0 : i32
    return %c0_i32, %arg0, %c0_i32_0 : i32, i32, i32
  }
  func.func @transform_5(%arg0: i32) -> (i32, i32, i32) {
    %c0_i32 = arith.constant 0 : i32
    %c0_i32_0 = arith.constant 0 : i32
    %c0_i32_1 = arith.constant 0 : i32
    return %c0_i32, %arg0, %c0_i32_0 : i32, i32, i32
  }
  func.func @transform_6(%arg0: i32) -> (i32, i32, i32) {
    %c0_i32 = arith.constant 0 : i32
    %c0_i32_0 = arith.constant 0 : i32
    %c0_i32_1 = arith.constant 0 : i32
    return %c0_i32, %arg0, %c0_i32_0 : i32, i32, i32
  }
}

module attributes {stable_mosaic.version = 11 : i64} {
  func.func @_qkv_proj_kernel(%arg0: i32, %arg1: memref<128x32xbf16, #tpu.memory_space<vmem>>, %arg2: memref<32x32xbf16, #tpu.memory_space<vmem>>, %arg3: memref<32x32xbf16, #tpu.memory_space<vmem>>, %arg4: memref<32x32xbf16, #tpu.memory_space<vmem>>, %arg5: memref<2x128x16xbf16, #tpu.memory_space<vmem>>, %arg6: memref<2x128x16xbf16, #tpu.memory_space<vmem>>, %arg7: memref<2x128x16xbf16, #tpu.memory_space<vmem>>) attributes {dimension_semantics = [#tpu.dimension_semantics<parallel>], iteration_bounds = array<i64: 1>, scalar_prefetch = 0 : i64, scratch_operands = 0 : i64, tpu.core_type = #tpu.core_type<tc>, window_params = [{transform_indices = @transform_0, window_bounds = array<i64: 128, 32>}, {pipeline_mode = #tpu.pipeline_mode<synchronous>, transform_indices = @transform_1, window_bounds = array<i64: 32, 32>}, {pipeline_mode = #tpu.pipeline_mode<synchronous>, transform_indices = @transform_2, window_bounds = array<i64: 32, 32>}, {pipeline_mode = #tpu.pipeline_mode<synchronous>, transform_indices = @transform_3, window_bounds = array<i64: 32, 32>}, {transform_indices = @transform_4, window_bounds = array<i64: 2, 128, 16>}, {transform_indices = @transform_5, window_bounds = array<i64: 2, 128, 16>}, {transform_indices = @transform_6, window_bounds = array<i64: 2, 128, 16>}]} {
    %c0 = arith.constant 0 : index
    %c0_0 = arith.constant 0 : index
    %0 = vector.load %arg1[%c0, %c0_0] : memref<128x32xbf16, #tpu.memory_space<vmem>>, vector<128x32xbf16>
    %c0_1 = arith.constant 0 : index
    %c0_2 = arith.constant 0 : index
    %1 = vector.load %arg2[%c0_1, %c0_2] : memref<32x32xbf16, #tpu.memory_space<vmem>>, vector<32x32xbf16>
    %cst = arith.constant dense<0.000000e+00> : vector<128x32xf32>
    %2 = tpu.matmul %0, %1, %cst {dimension_numbers = #tpu.dot_dimension_numbers<[1], [0], [0], [1], [0, 0, 1, 1], [], []>} : vector<128x32xbf16>, vector<32x32xbf16>, vector<128x32xf32> -> vector<128x32xf32>
    %3 = vector.extract_strided_slice %2 {offsets = [0, 0], sizes = [128, 16], strides = [1, 1]} : vector<128x32xf32> to vector<128x16xf32>
    %4 = arith.truncf %3 : vector<128x16xf32> to vector<128x16xbf16>
    %c0_3 = arith.constant 0 : index
    %c0_4 = arith.constant 0 : index
    %c0_5 = arith.constant 0 : index
    %5 = vector.load %arg5[%c0_3, %c0_4, %c0_5] : memref<2x128x16xbf16, #tpu.memory_space<vmem>>, vector<1x128x16xbf16>
    %6 = vector.shape_cast %5 : vector<1x128x16xbf16> to vector<128x16xbf16>
    %7 = vector.shape_cast %4 : vector<128x16xbf16> to vector<1x128x16xbf16>
    tpu.vector_store %arg5[%c0_3, %c0_4, %c0_5], %7 {strides = array<i32>} : memref<2x128x16xbf16, #tpu.memory_space<vmem>>, vector<1x128x16xbf16>,
    %8 = vector.extract_strided_slice %2 {offsets = [0, 16], sizes = [128, 16], strides = [1, 1]} : vector<128x32xf32> to vector<128x16xf32>
    %9 = arith.truncf %8 : vector<128x16xf32> to vector<128x16xbf16>
    %c1 = arith.constant 1 : index
    %c0_6 = arith.constant 0 : index
    %c0_7 = arith.constant 0 : index
    %10 = vector.load %arg5[%c1, %c0_6, %c0_7] : memref<2x128x16xbf16, #tpu.memory_space<vmem>>, vector<1x128x16xbf16>
    %11 = vector.shape_cast %10 : vector<1x128x16xbf16> to vector<128x16xbf16>
    %12 = vector.shape_cast %9 : vector<128x16xbf16> to vector<1x128x16xbf16>
    tpu.vector_store %arg5[%c1, %c0_6, %c0_7], %12 {strides = array<i32>} : memref<2x128x16xbf16, #tpu.memory_space<vmem>>, vector<1x128x16xbf16>,
    %c0_8 = arith.constant 0 : index
    %c0_9 = arith.constant 0 : index
    %13 = vector.load %arg3[%c0_8, %c0_9] : memref<32x32xbf16, #tpu.memory_space<vmem>>, vector<32x32xbf16>
    %cst_10 = arith.constant dense<0.000000e+00> : vector<128x32xf32>
    %14 = tpu.matmul %0, %13, %cst_10 {dimension_numbers = #tpu.dot_dimension_numbers<[1], [0], [0], [1], [0, 0, 1, 1], [], []>} : vector<128x32xbf16>, vector<32x32xbf16>, vector<128x32xf32> -> vector<128x32xf32>
    %15 = vector.extract_strided_slice %14 {offsets = [0, 0], sizes = [128, 16], strides = [1, 1]} : vector<128x32xf32> to vector<128x16xf32>
    %16 = arith.truncf %15 : vector<128x16xf32> to vector<128x16xbf16>
    %c0_11 = arith.constant 0 : index
    %c0_12 = arith.constant 0 : index
    %c0_13 = arith.constant 0 : index
    %17 = vector.load %arg6[%c0_11, %c0_12, %c0_13] : memref<2x128x16xbf16, #tpu.memory_space<vmem>>, vector<1x128x16xbf16>
    %18 = vector.shape_cast %17 : vector<1x128x16xbf16> to vector<128x16xbf16>
    %19 = vector.shape_cast %16 : vector<128x16xbf16> to vector<1x128x16xbf16>
    tpu.vector_store %arg6[%c0_11, %c0_12, %c0_13], %19 {strides = array<i32>} : memref<2x128x16xbf16, #tpu.memory_space<vmem>>, vector<1x128x16xbf16>,
    %20 = vector.extract_strided_slice %14 {offsets = [0, 16], sizes = [128, 16], strides = [1, 1]} : vector<128x32xf32> to vector<128x16xf32>
    %21 = arith.truncf %20 : vector<128x16xf32> to vector<128x16xbf16>
    %c1_14 = arith.constant 1 : index
    %c0_15 = arith.constant 0 : index
    %c0_16 = arith.constant 0 : index
    %22 = vector.load %arg6[%c1_14, %c0_15, %c0_16] : memref<2x128x16xbf16, #tpu.memory_space<vmem>>, vector<1x128x16xbf16>
    %23 = vector.shape_cast %22 : vector<1x128x16xbf16> to vector<128x16xbf16>
    %24 = vector.shape_cast %21 : vector<128x16xbf16> to vector<1x128x16xbf16>
    tpu.vector_store %arg6[%c1_14, %c0_15, %c0_16], %24 {strides = array<i32>} : memref<2x128x16xbf16, #tpu.memory_space<vmem>>, vector<1x128x16xbf16>,
    %c0_17 = arith.constant 0 : index
    %c0_18 = arith.constant 0 : index
    %25 = vector.load %arg4[%c0_17, %c0_18] : memref<32x32xbf16, #tpu.memory_space<vmem>>, vector<32x32xbf16>
    %cst_19 = arith.constant dense<0.000000e+00> : vector<128x32xf32>
    %26 = tpu.matmul %0, %25, %cst_19 {dimension_numbers = #tpu.dot_dimension_numbers<[1], [0], [0], [1], [0, 0, 1, 1], [], []>} : vector<128x32xbf16>, vector<32x32xbf16>, vector<128x32xf32> -> vector<128x32xf32>
    %27 = vector.extract_strided_slice %26 {offsets = [0, 0], sizes = [128, 16], strides = [1, 1]} : vector<128x32xf32> to vector<128x16xf32>
    %28 = arith.truncf %27 : vector<128x16xf32> to vector<128x16xbf16>
    %c0_20 = arith.constant 0 : index
    %c0_21 = arith.constant 0 : index
    %c0_22 = arith.constant 0 : index
    %29 = vector.load %arg7[%c0_20, %c0_21, %c0_22] : memref<2x128x16xbf16, #tpu.memory_space<vmem>>, vector<1x128x16xbf16>
    %30 = vector.shape_cast %29 : vector<1x128x16xbf16> to vector<128x16xbf16>
    %31 = vector.shape_cast %28 : vector<128x16xbf16> to vector<1x128x16xbf16>
    tpu.vector_store %arg7[%c0_20, %c0_21, %c0_22], %31 {strides = array<i32>} : memref<2x128x16xbf16, #tpu.memory_space<vmem>>, vector<1x128x16xbf16>,
    %32 = vector.extract_strided_slice %26 {offsets = [0, 16], sizes = [128, 16], strides = [1, 1]} : vector<128x32xf32> to vector<128x16xf32>
    %33 = arith.truncf %32 : vector<128x16xf32> to vector<128x16xbf16>
    %c1_23 = arith.constant 1 : index
    %c0_24 = arith.constant 0 : index
    %c0_25 = arith.constant 0 : index
    %34 = vector.load %arg7[%c1_23, %c0_24, %c0_25] : memref<2x128x16xbf16, #tpu.memory_space<vmem>>, vector<1x128x16xbf16>
    %35 = vector.shape_cast %34 : vector<1x128x16xbf16> to vector<128x16xbf16>
    %36 = vector.shape_cast %33 : vector<128x16xbf16> to vector<1x128x16xbf16>
    tpu.vector_store %arg7[%c1_23, %c0_24, %c0_25], %36 {strides = array<i32>} : memref<2x128x16xbf16, #tpu.memory_space<vmem>>, vector<1x128x16xbf16>,
    return
  }
  func.func @transform_0(%arg0: i32) -> (i32, i32) {
    %c0_i32 = arith.constant 0 : i32
    %c0_i32_0 = arith.constant 0 : i32
    return %arg0, %c0_i32 : i32, i32
  }
  func.func @transform_1(%arg0: i32) -> (i32, i32) {
    %c0_i32 = arith.constant 0 : i32
    %c0_i32_0 = arith.constant 0 : i32
    %c0_i32_1 = arith.constant 0 : i32
    return %c0_i32, %c0_i32_0 : i32, i32
  }
  func.func @transform_2(%arg0: i32) -> (i32, i32) {
    %c0_i32 = arith.constant 0 : i32
    %c0_i32_0 = arith.constant 0 : i32
    %c0_i32_1 = arith.constant 0 : i32
    return %c0_i32, %c0_i32_0 : i32, i32
  }
  func.func @transform_3(%arg0: i32) -> (i32, i32) {
    %c0_i32 = arith.constant 0 : i32
    %c0_i32_0 = arith.constant 0 : i32
    %c0_i32_1 = arith.constant 0 : i32
    return %c0_i32, %c0_i32_0 : i32, i32
  }
  func.func @transform_4(%arg0: i32) -> (i32, i32, i32) {
    %c0_i32 = arith.constant 0 : i32
    %c0_i32_0 = arith.constant 0 : i32
    %c0_i32_1 = arith.constant 0 : i32
    return %c0_i32, %arg0, %c0_i32_0 : i32, i32, i32
  }
  func.func @transform_5(%arg0: i32) -> (i32, i32, i32) {
    %c0_i32 = arith.constant 0 : i32
    %c0_i32_0 = arith.constant 0 : i32
    %c0_i32_1 = arith.constant 0 : i32
    return %c0_i32, %arg0, %c0_i32_0 : i32, i32, i32
  }
  func.func @transform_6(%arg0: i32) -> (i32, i32, i32) {
    %c0_i32 = arith.constant 0 : i32
    %c0_i32_0 = arith.constant 0 : i32
    %c0_i32_1 = arith.constant 0 : i32
    return %c0_i32, %arg0, %c0_i32_0 : i32, i32, i32
  }
}

</mosaic_0001>

<bundles_post_ra>
// kernel: tpu_custom_call.1
= control target key start
LH: loop header
LB: loop body
LE: loop exit
PB: predicated region body
PF: predicated region fallthrough
CT: control target
= control target key end

     0   :  { %vm93_vm0 = vcmask 261120   ;;  %vm183_vm1 = vcmask 125952   ;;  %s798_s24 = smov 112   ;;  %s1332_s1 = inlined_call_operand.vmem [shape: bf16[32,32], index: 1, kind: input, shape index: {}]   ;;  %s1333_s2 = inlined_call_operand.vmem [shape: bf16[32,32], index: 2, kind: input, shape index: {}]   ;;  %s1334_s3 = inlined_call_operand.vmem [shape: bf16[32,32], index: 3, kind: input, shape index: {}]   ;;  %s1335_s0 = inlined_call_operand.vmem [shape: bf16[128,32], index: 0, kind: input, shape index: {}]   ;;  %s1336_s4 = inlined_call_operand.vmem [shape: bf16[2,128,16], index: 4, kind: output, shape index: {0}]   ;;  %s1337_s5 = inlined_call_operand.vmem [shape: bf16[2,128,16], index: 5, kind: output, shape index: {1}]   ;;  %s1338_s6 = inlined_call_operand.vmem [shape: bf16[2,128,16], index: 6, kind: output, shape index: {2}]  }
   0x1   :  { %v786_v0 = vld [vmem:[%s1332_s1 + $0x8] sm:$0xff]  ;;  %v785_v3 = vld [vmem:[%s1332_s1] sm:$0xff]  ;;  %v783_v7 = vld [vmem:[%s1335_s0 + $0x30] sm:$0xff] }
   0x2   :  { %v788_v1 = vld [vmem:[%s1333_s2 + $0x8] sm:$0xff]  ;;  %124 = vmatpush.bf16.msra.mxu0 %v786_v0  ;;  %791 = vmatpush.bf16.msra.mxu3 %v786_v0  ;;  %v787_v4 = vld [vmem:[%s1333_s2] sm:$0xff]  ;;  %v784_v9 = vld [vmem:[%s1335_s0 + $0x38] sm:$0xff] }
   0x3   :  { %v790_v2 = vld [vmem:[%s1334_s3 + $0x8] sm:$0xff]  ;;  %303 = vmatpush.bf16.msra.mxu1 %v788_v1  ;;  %v789_v5 = vld [vmem:[%s1334_s3] sm:$0xff]  ;;  %v779_v10 = vld [vmem:[%s1335_s0 + $0x10] sm:$0xff] }
   0x4   :  { %481 = vmatpush.bf16.msra.mxu2 %v790_v2  ;;  %v777_v6 = vld [vmem:[%s1335_s0] sm:$0xff]  ;;  %v778_v8 = vld [vmem:[%s1335_s0 + $0x8] sm:$0xff]  ;;  %v780_v11 = vld [vmem:[%s1335_s0 + $0x18] sm:$0xff] }
   0x5   :  { %v781_v12 = vld [vmem:[%s1335_s0 + $0x20] sm:$0xff]  ;;  %v782_v13 = vld [vmem:[%s1335_s0 + $0x28] sm:$0xff] }
   0x6   :  { %125 = vmatpush.bf16.msra.mxu0 %v785_v3  ;;  %792 = vmatpush.bf16.msra.mxu3 %v785_v3 }
   0x7   :  { %304 = vmatpush.bf16.msra.mxu1 %v787_v4 }
   0x8   :  { %482 = vmatpush.bf16.msra.mxu2 %v789_v5 }
   0x9   :  { %689 = vmatmul.msk.bf16.vlgmr.msra.gmra.mxu0 %vm93_vm0, %v777_v6  ;;  %695 = vmatmul.msk.bf16.vlgmr.msra.gmra.mxu3 %vm93_vm0, %v783_v7 }
   0xa   :  { %793 = vmatpush.bf16.msrb.mxu3 %v788_v1  ;;  %721 = vmatmul.msk.bf16.vlgmr.msra.gmra.mxu1 %vm93_vm0, %v777_v6 }
   0xb   :  { %753 = vmatmul.msk.bf16.vlgmr.msra.gmra.mxu2 %vm93_vm0, %v777_v6 }
   0xe   :  { %794 = vmatpush.bf16.msrb.mxu3 %v787_v4 }
  0x12   :  { %795 = vmatpush.bf16.msra.mxu3 %v790_v2 }
  0x16   :  { %796 = vmatpush.bf16.msra.mxu3 %v789_v5 }
  0x19   :  { %690 = vmatmul.msk.bf16.gmra.mxu0 %vm93_vm0, %v778_v8  ;;  %696 = vmatmul.msk.bf16.gmra.mxu3 %vm93_vm0, %v784_v9 }
  0x1a   :  { %722 = vmatmul.msk.bf16.gmra.mxu1 %vm93_vm0, %v778_v8 }
  0x1b   :  { %754 = vmatmul.msk.bf16.gmra.mxu2 %vm93_vm0, %v778_v8 }
  0x29   :  { %691 = vmatmul.msk.bf16.gmra.mxu0 %vm93_vm0, %v779_v10  ;;  %727 = vmatmul.msk.bf16.vlgmr.msrb.gmra.mxu3 %vm93_vm0, %v783_v7 }
  0x2a   :  { %723 = vmatmul.msk.bf16.gmra.mxu1 %vm93_vm0, %v779_v10 }
  0x2b   :  { %755 = vmatmul.msk.bf16.gmra.mxu2 %vm93_vm0, %v779_v10 }
  0x39   :  { %692 = vmatmul.msk.bf16.gmra.mxu0 %vm93_vm0, %v780_v11  ;;  %728 = vmatmul.msk.bf16.gmra.mxu3 %vm93_vm0, %v784_v9 }
  0x3a   :  { %724 = vmatmul.msk.bf16.gmra.mxu1 %vm93_vm0, %v780_v11 }
  0x3b   :  { %756 = vmatmul.msk.bf16.gmra.mxu2 %vm93_vm0, %v780_v11 }
  0x49   :  { %693 = vmatmul.msk.bf16.gmra.mxu0 %vm93_vm0, %v781_v12  ;;  %759 = vmatmul.msk.bf16.vlgmr.msra.gmra.mxu3 %vm93_vm0, %v783_v7 }
  0x4a   :  { %725 = vmatmul.msk.bf16.gmra.mxu1 %vm93_vm0, %v781_v12 }
  0x4b   :  { %757 = vmatmul.msk.bf16.gmra.mxu2 %vm93_vm0, %v781_v12 }
  0x59   :  { %694 = vmatmul.msk.bf16.gmra.mxu0 %vm93_vm0, %v782_v13  ;;  %760 = vmatmul.msk.bf16.gmra.mxu3 %vm93_vm0, %v784_v9 }
  0x5a   :  { %726 = vmatmul.msk.bf16.gmra.mxu1 %vm93_vm0, %v782_v13 }
  0x5b   :  { %758 = vmatmul.msk.bf16.gmra.mxu2 %vm93_vm0, %v782_v13 }
  0x86   :  { %v127_v14 = vpop.f32.mrf.mxu0 }
  0x87   :  { %v167_v15 = vpack.c.bf16 %v127_v14, %v127_v14  ;;  %v306_v16 = vpop.f32.mrf.mxu1 }
  0x88   :  { %v346_v17 = vpack.c.bf16 %v306_v16, %v306_v16 }
  0x89   :  { %184 = vst.msk [vmem:[%s1336_s4] sm:$0xf] %vm183_vm1, %v167_v15  ;;  %216 = vrot.lane.b32.xlu0 %v167_v15, %s798_s24 }
  0x8a   :  { %362 = vst.msk [vmem:[%s1337_s5] sm:$0xf] %vm183_vm1, %v346_v17  ;;  %394 = vrot.lane.b32.xlu1 %v346_v17, %s798_s24 }
  0x8c   :  { %v157_v18 = vpop.f32.mrf.mxu3 }
  0x8d   :  { %v179_v19 = vpack.c.bf16 %v157_v18, %v157_v18 }
  0x8e   :  { %v484_v20 = vpop.f32.mrf.mxu2  ;;  %v129_v22 = vpop.f32.mrf.mxu0 }
  0x8f   :  { %v524_v21 = vpack.c.bf16 %v484_v20, %v484_v20  ;;  %196 = vst.msk [vmem:[%s1336_s4 + $0x30] sm:$0xf] %vm183_vm1, %v179_v19  ;;  %v168_v23 = vpack.c.bf16 %v129_v22, %v129_v22  ;;  %v308_v24 = vpop.f32.mrf.mxu1 }
  0x90   :  { %v347_v25 = vpack.c.bf16 %v308_v24, %v308_v24 }
  0x91   :  { %540 = vst.msk [vmem:[%s1338_s6] sm:$0xf] %vm183_vm1, %v524_v21  ;;  %572 = vrot.lane.b32.xlu2 %v524_v21, %s798_s24  ;;  %240 = vrot.lane.b32.xlu0 %v179_v19, %s798_s24 }
  0x92   :  { %185 = vst.msk [vmem:[%s1336_s4 + $0x4] sm:$0xf] %vm183_vm1, %v168_v23 }
  0x93   :  { %363 = vst.msk [vmem:[%s1337_s5 + $0x4] sm:$0xf] %vm183_vm1, %v347_v25 }
  0x94   :  { %v159_v26 = vpop.f32.mrf.mxu3 }
  0x95   :  { %v180_v27 = vpack.c.bf16 %v159_v26, %v159_v26 }
  0x96   :  { %v486_v28 = vpop.f32.mrf.mxu2  ;;  %v132_v30 = vpop.f32.mrf.mxu0 }
  0x97   :  { %v525_v29 = vpack.c.bf16 %v486_v28, %v486_v28  ;;  %197 = vst.msk [vmem:[%s1336_s4 + $0x34] sm:$0xf] %vm183_vm1, %v180_v27  ;;  %v169_v31 = vpack.c.bf16 %v132_v30, %v132_v30  ;;  %242 = vrot.lane.b32.xlu1 %v180_v27, %s798_s24  ;;  %v311_v32 = vpop.f32.mrf.mxu1 }
  0x98   :  { %v348_v33 = vpack.c.bf16 %v311_v32, %v311_v32 }
  0x99   :  { %541 = vst.msk [vmem:[%s1338_s6 + $0x4] sm:$0xf] %vm183_vm1, %v525_v29  ;;  %396 = vrot.lane.b32.xlu2 %v347_v25, %s798_s24  ;;  %218 = vrot.lane.b32.xlu0 %v168_v23, %s798_s24 }
  0x9a   :  { %186 = vst.msk [vmem:[%s1336_s4 + $0x8] sm:$0xf] %vm183_vm1, %v169_v31 }
  0x9b   :  { %364 = vst.msk [vmem:[%s1337_s5 + $0x8] sm:$0xf] %vm183_vm1, %v348_v33 }
  0x9c   :  { %v162_v34 = vpop.f32.mrf.mxu3 }
  0x9d   :  { %v181_v35 = vpack.c.bf16 %v162_v34, %v162_v34 }
  0x9e   :  { %v489_v36 = vpop.f32.mrf.mxu2  ;;  %v134_v38 = vpop.f32.mrf.mxu0 }
  0x9f   :  { %v526_v37 = vpack.c.bf16 %v489_v36, %v489_v36  ;;  %198 = vst.msk [vmem:[%s1336_s4 + $0x38] sm:$0xf] %vm183_vm1, %v181_v35  ;;  %v170_v39 = vpack.c.bf16 %v134_v38, %v134_v38  ;;  %220 = vrot.lane.b32.xlu1 %v169_v31, %s798_s24  ;;  %v313_v40 = vpop.f32.mrf.mxu1 }
  0xa0   :  { %v349_v41 = vpack.c.bf16 %v313_v40, %v313_v40 }
  0xa1   :  { %542 = vst.msk [vmem:[%s1338_s6 + $0x8] sm:$0xf] %vm183_vm1, %v526_v37  ;;  %244 = vrot.lane.b32.xlu2 %v181_v35, %s798_s24  ;;  %574 = vrot.lane.b32.xlu0 %v525_v29, %s798_s24 }
  0xa2   :  { %187 = vst.msk [vmem:[%s1336_s4 + $0xc] sm:$0xf] %vm183_vm1, %v170_v39 }
  0xa3   :  { %365 = vst.msk [vmem:[%s1337_s5 + $0xc] sm:$0xf] %vm183_vm1, %v349_v41 }
  0xa4   :  { %v164_v42 = vpop.f32.mrf.mxu3 }
  0xa5   :  { %v182_v44 = vpack.c.bf16 %v164_v42, %v164_v42 }
  0xa6   :  { %v491_v43 = vpop.f32.mrf.mxu2  ;;  %v137_v46 = vpop.f32.mrf.mxu0 }
  0xa7   :  { %v527_v45 = vpack.c.bf16 %v491_v43, %v491_v43  ;;  %576 = vrot.lane.b32.xlu1 %v526_v37, %s798_s24  ;;  %v171_v47 = vpack.c.bf16 %v137_v46, %v137_v46  ;;  %199 = vst.msk [vmem:[%s1336_s4 + $0x3c] sm:$0xf] %vm183_vm1, %v182_v44  ;;  %v316_v48 = vpop.f32.mrf.mxu1 }
  0xa8   :  { %v350_v49 = vpack.c.bf16 %v316_v48, %v316_v48 }
  0xa9   :  { %543 = vst.msk [vmem:[%s1338_s6 + $0xc] sm:$0xf] %vm183_vm1, %v527_v45  ;;  %578 = vrot.lane.b32.xlu2 %v527_v45, %s798_s24  ;;  %398 = vrot.lane.b32.xlu0 %v348_v33, %s798_s24 }
  0xaa   :  { %188 = vst.msk [vmem:[%s1336_s4 + $0x10] sm:$0xf] %vm183_vm1, %v171_v47 }
  0xab   :  { %366 = vst.msk [vmem:[%s1337_s5 + $0x10] sm:$0xf] %vm183_vm1, %v350_v49 }
  0xac   :  { %v336_v50 = vpop.f32.mrf.mxu3 }
  0xad   :  { %v358_v51 = vpack.c.bf16 %v336_v50, %v336_v50 }
  0xae   :  { %v494_v52 = vpop.f32.mrf.mxu2  ;;  %v139_v54 = vpop.f32.mrf.mxu0 }
  0xaf   :  { %v528_v53 = vpack.c.bf16 %v494_v52, %v494_v52  ;;  %222 = vrot.lane.b32.xlu1 %v170_v39, %s798_s24  ;;  %374 = vst.msk [vmem:[%s1337_s5 + $0x30] sm:$0xf] %vm183_vm1, %v358_v51  ;;  %v172_v55 = vpack.c.bf16 %v139_v54, %v139_v54  ;;  %v318_v56 = vpop.f32.mrf.mxu1 }
  0xb0   :  { %v351_v57 = vpack.c.bf16 %v318_v56, %v318_v56 }
  0xb1   :  { %224 = vrot.lane.b32.xlu2 %v171_v47, %s798_s24  ;;  %544 = vst.msk [vmem:[%s1338_s6 + $0x10] sm:$0xf] %vm183_vm1, %v528_v53  ;;  %246 = vrot.lane.b32.xlu0 %v182_v44, %s798_s24 }
  0xb2   :  { %189 = vst.msk [vmem:[%s1336_s4 + $0x14] sm:$0xf] %vm183_vm1, %v172_v55 }
  0xb3   :  { %367 = vst.msk [vmem:[%s1337_s5 + $0x14] sm:$0xf] %vm183_vm1, %v351_v57 }
  0xb4   :  { %v338_v58 = vpop.f32.mrf.mxu3 }
  0xb5   :  { %v359_v59 = vpack.c.bf16 %v338_v58, %v338_v58 }
  0xb6   :  { %v496_v60 = vpop.f32.mrf.mxu2  ;;  %v142_v62 = vpop.f32.mrf.mxu0 }
  0xb7   :  { %v529_v61 = vpack.c.bf16 %v496_v60, %v496_v60  ;;  %400 = vrot.lane.b32.xlu1 %v349_v41, %s798_s24  ;;  %375 = vst.msk [vmem:[%s1337_s5 + $0x34] sm:$0xf] %vm183_vm1, %v359_v59  ;;  %v173_v63 = vpack.c.bf16 %v142_v62, %v142_v62  ;;  %v321_v0 = vpop.f32.mrf.mxu1 }
  0xb8   :  { %v352_v1 = vpack.c.bf16 %v321_v0, %v321_v0 }
  0xb9   :  { %402 = vrot.lane.b32.xlu2 %v350_v49, %s798_s24  ;;  %545 = vst.msk [vmem:[%s1338_s6 + $0x14] sm:$0xf] %vm183_vm1, %v529_v61  ;;  %580 = vrot.lane.b32.xlu0 %v528_v53, %s798_s24 }
  0xba   :  { %190 = vst.msk [vmem:[%s1336_s4 + $0x18] sm:$0xf] %vm183_vm1, %v173_v63 }
  0xbb   :  { %368 = vst.msk [vmem:[%s1337_s5 + $0x18] sm:$0xf] %vm183_vm1, %v352_v1 }
  0xbc   :  { %v341_v2 = vpop.f32.mrf.mxu3 }
  0xbd   :  { %v360_v3 = vpack.c.bf16 %v341_v2, %v341_v2 }
  0xbe   :  { %v499_v4 = vpop.f32.mrf.mxu2  ;;  %v144_v5 = vpop.f32.mrf.mxu0 }
  0xbf   :  { %v530_v6 = vpack.c.bf16 %v499_v4, %v499_v4  ;;  %418 = vrot.lane.b32.xlu1 %v358_v51, %s798_s24  ;;  %v174_v7 = vpack.c.bf16 %v144_v5, %v144_v5  ;;  %v323_v8 = vpop.f32.mrf.mxu1  ;;  %376 = vst.msk [vmem:[%s1337_s5 + $0x38] sm:$0xf] %vm183_vm1, %v360_v3 }
  0xc0   :  { %v353_v9 = vpack.c.bf16 %v323_v8, %v323_v8 }
  0xc1   :  { %226 = vrot.lane.b32.xlu2 %v172_v55, %s798_s24  ;;  %546 = vst.msk [vmem:[%s1338_s6 + $0x18] sm:$0xf] %vm183_vm1, %v530_v6  ;;  %404 = vrot.lane.b32.xlu0 %v351_v57, %s798_s24 }
  0xc2   :  { %191 = vst.msk [vmem:[%s1336_s4 + $0x1c] sm:$0xf] %vm183_vm1, %v174_v7 }
  0xc3   :  { %369 = vst.msk [vmem:[%s1337_s5 + $0x1c] sm:$0xf] %vm183_vm1, %v353_v9 }
  0xc4   :  { %v343_v10 = vpop.f32.mrf.mxu3 }
  0xc5   :  { %v361_v11 = vpack.c.bf16 %v343_v10, %v343_v10 }
  0xc6   :  { %v501_v12 = vpop.f32.mrf.mxu2  ;;  %v147_v14 = vpop.f32.mrf.mxu0 }
  0xc7   :  { %v531_v13 = vpack.c.bf16 %v501_v12, %v501_v12  ;;  %582 = vrot.lane.b32.xlu1 %v529_v61, %s798_s24  ;;  %377 = vst.msk [vmem:[%s1337_s5 + $0x3c] sm:$0xf] %vm183_vm1, %v361_v11  ;;  %v175_v15 = vpack.c.bf16 %v147_v14, %v147_v14  ;;  %v326_v16 = vpop.f32.mrf.mxu1 }
  0xc8   :  { %v354_v17 = vpack.c.bf16 %v326_v16, %v326_v16 }
  0xc9   :  { %420 = vrot.lane.b32.xlu2 %v359_v59, %s798_s24  ;;  %547 = vst.msk [vmem:[%s1338_s6 + $0x1c] sm:$0xf] %vm183_vm1, %v531_v13  ;;  %228 = vrot.lane.b32.xlu0 %v173_v63, %s798_s24 }
  0xca   :  { %192 = vst.msk [vmem:[%s1336_s4 + $0x20] sm:$0xf] %vm183_vm1, %v175_v15 }
  0xcb   :  { %370 = vst.msk [vmem:[%s1337_s5 + $0x20] sm:$0xf] %vm183_vm1, %v354_v17 }
  0xcc   :  { %v514_v18 = vpop.f32.mrf.mxu3 }
  0xcd   :  { %v536_v20 = vpack.c.bf16 %v514_v18, %v514_v18 }
  0xce   :  { %v504_v19 = vpop.f32.mrf.mxu2  ;;  %v149_v22 = vpop.f32.mrf.mxu0 }
  0xcf   :  { %v532_v21 = vpack.c.bf16 %v504_v19, %v504_v19  ;;  %406 = vrot.lane.b32.xlu1 %v352_v1, %s798_s24  ;;  %v176_v23 = vpack.c.bf16 %v149_v22, %v149_v22  ;;  %v328_v24 = vpop.f32.mrf.mxu1  ;;  %552 = vst.msk [vmem:[%s1338_s6 + $0x30] sm:$0xf] %vm183_vm1, %v536_v20 }
  0xd0   :  { %v355_v25 = vpack.c.bf16 %v328_v24, %v328_v24 }
  0xd1   :  { %584 = vrot.lane.b32.xlu2 %v530_v6, %s798_s24  ;;  %548 = vst.msk [vmem:[%s1338_s6 + $0x20] sm:$0xf] %vm183_vm1, %v532_v21  ;;  %422 = vrot.lane.b32.xlu0 %v360_v3, %s798_s24 }
  0xd2   :  { %193 = vst.msk [vmem:[%s1336_s4 + $0x24] sm:$0xf] %vm183_vm1, %v176_v23 }
  0xd3   :  { %371 = vst.msk [vmem:[%s1337_s5 + $0x24] sm:$0xf] %vm183_vm1, %v355_v25 }
  0xd4   :  { %v516_v26 = vpop.f32.mrf.mxu3 }
  0xd5   :  { %v537_v28 = vpack.c.bf16 %v516_v26, %v516_v26 }
  0xd6   :  { %v506_v27 = vpop.f32.mrf.mxu2  ;;  %v152_v30 = vpop.f32.mrf.mxu0 }
  0xd7   :  { %v533_v29 = vpack.c.bf16 %v506_v27, %v506_v27  ;;  %230 = vrot.lane.b32.xlu1 %v174_v7, %s798_s24  ;;  %v177_v31 = vpack.c.bf16 %v152_v30, %v152_v30  ;;  %v331_v32 = vpop.f32.mrf.mxu1  ;;  %553 = vst.msk [vmem:[%s1338_s6 + $0x34] sm:$0xf] %vm183_vm1, %v537_v28 }
  0xd8   :  { %v356_v33 = vpack.c.bf16 %v331_v32, %v331_v32 }
  0xd9   :  { %408 = vrot.lane.b32.xlu2 %v353_v9, %s798_s24  ;;  %549 = vst.msk [vmem:[%s1338_s6 + $0x24] sm:$0xf] %vm183_vm1, %v533_v29  ;;  %586 = vrot.lane.b32.xlu0 %v531_v13, %s798_s24 }
  0xda   :  { %194 = vst.msk [vmem:[%s1336_s4 + $0x28] sm:$0xf] %vm183_vm1, %v177_v31 }
  0xdb   :  { %372 = vst.msk [vmem:[%s1337_s5 + $0x28] sm:$0xf] %vm183_vm1, %v356_v33 }
  0xdc   :  { %v519_v34 = vpop.f32.mrf.mxu3 }
  0xdd   :  { %v538_v36 = vpack.c.bf16 %v519_v34, %v519_v34 }
  0xde   :  { %v509_v35 = vpop.f32.mrf.mxu2  ;;  %v154_v38 = vpop.f32.mrf.mxu0 }
  0xdf   :  { %v534_v37 = vpack.c.bf16 %v509_v35, %v509_v35  ;;  %424 = vrot.lane.b32.xlu1 %v361_v11, %s798_s24  ;;  %v178_v39 = vpack.c.bf16 %v154_v38, %v154_v38  ;;  %v333_v40 = vpop.f32.mrf.mxu1  ;;  %554 = vst.msk [vmem:[%s1338_s6 + $0x38] sm:$0xf] %vm183_vm1, %v538_v36 }
  0xe0   :  { %v357_v41 = vpack.c.bf16 %v333_v40, %v333_v40 }
  0xe1   :  { %232 = vrot.lane.b32.xlu2 %v175_v15, %s798_s24  ;;  %550 = vst.msk [vmem:[%s1338_s6 + $0x28] sm:$0xf] %vm183_vm1, %v534_v37  ;;  %410 = vrot.lane.b32.xlu0 %v354_v17, %s798_s24 }
  0xe2   :  { %195 = vst.msk [vmem:[%s1336_s4 + $0x2c] sm:$0xf] %vm183_vm1, %v178_v39 }
  0xe3   :  { %373 = vst.msk [vmem:[%s1337_s5 + $0x2c] sm:$0xf] %vm183_vm1, %v357_v41 }
  0xe4   :  { %v521_v42 = vpop.f32.mrf.mxu3 }
  0xe5   :  { %v539_v44 = vpack.c.bf16 %v521_v42, %v521_v42 }
  0xe6   :  { %v511_v43 = vpop.f32.mrf.mxu2 }
  0xe7   :  { %v535_v45 = vpack.c.bf16 %v511_v43, %v511_v43  ;;  %588 = vrot.lane.b32.xlu1 %v532_v21, %s798_s24  ;;  %555 = vst.msk [vmem:[%s1338_s6 + $0x3c] sm:$0xf] %vm183_vm1, %v539_v44 }
  0xe9   :  { %596 = vrot.lane.b32.xlu2 %v536_v20, %s798_s24  ;;  %551 = vst.msk [vmem:[%s1338_s6 + $0x2c] sm:$0xf] %vm183_vm1, %v535_v45  ;;  %234 = vrot.lane.b32.xlu0 %v176_v23, %s798_s24 }
  0xeb   :  { %v573_v46 = vpop.permute.xlu2 %572 }
  0xec   :  { %761 = vst.msk [vmem:[%s1338_s6 + $0x40] sm:$0xf] %vm183_vm1, %v573_v46 }
  0xef   :  { %412 = vrot.lane.b32.xlu1 %v355_v25, %s798_s24 }
  0xf1   :  { %590 = vrot.lane.b32.xlu2 %v533_v29, %s798_s24  ;;  %592 = vrot.lane.b32.xlu0 %v534_v37, %s798_s24 }
  0xf3   :  { %v397_v47 = vpop.permute.xlu2 %396 }
  0xf4   :  { %730 = vst.msk [vmem:[%s1337_s5 + $0x44] sm:$0xf] %vm183_vm1, %v397_v47 }
  0xf7   :  { %236 = vrot.lane.b32.xlu1 %v177_v31, %s798_s24 }
  0xf9   :  { %414 = vrot.lane.b32.xlu2 %v356_v33, %s798_s24  ;;  %416 = vrot.lane.b32.xlu0 %v357_v41, %s798_s24 }
  0xfb   :  { %v245_v48 = vpop.permute.xlu2 %244  ;;  %v217_v49 = vpop.permute.xlu0 %216 }
  0xfc   :  { %711 = vst.msk [vmem:[%s1336_s4 + $0x78] sm:$0xf] %vm183_vm1, %v245_v48  ;;  %v395_v50 = vpop.permute.xlu1 %394 }
  0xfd   :  { %697 = vst.msk [vmem:[%s1336_s4 + $0x40] sm:$0xf] %vm183_vm1, %v217_v49 }
  0xfe   :  { %729 = vst.msk [vmem:[%s1337_s5 + $0x40] sm:$0xf] %vm183_vm1, %v395_v50 }
  0xff   :  { %594 = vrot.lane.b32.xlu1 %v535_v45, %s798_s24 }
 0x101   :  { %238 = vrot.lane.b32.xlu2 %v178_v39, %s798_s24  ;;  %598 = vrot.lane.b32.xlu0 %v537_v28, %s798_s24 }
 0x103   :  { %v579_v51 = vpop.permute.xlu2 %578  ;;  %v241_v52 = vpop.permute.xlu0 %240 }
 0x104   :  { %764 = vst.msk [vmem:[%s1338_s6 + $0x4c] sm:$0xf] %vm183_vm1, %v579_v51 }
 0x105   :  { %709 = vst.msk [vmem:[%s1336_s4 + $0x70] sm:$0xf] %vm183_vm1, %v241_v52 }
 0x107   :  { %600 = vrot.lane.b32.xlu1 %v538_v36, %s798_s24 }
 0x109   :  { %602 = vrot.lane.b32.xlu2 %v539_v44, %s798_s24  ;;  %v243_v53 = vpop.permute.xlu1 %242 }
 0x10a   :  { %710 = vst.msk [vmem:[%s1336_s4 + $0x74] sm:$0xf] %vm183_vm1, %v243_v53 }
 0x10b   :  { %v225_v54 = vpop.permute.xlu2 %224  ;;  %v219_v55 = vpop.permute.xlu0 %218 }
 0x10c   :  { %701 = vst.msk [vmem:[%s1336_s4 + $0x50] sm:$0xf] %vm183_vm1, %v225_v54 }
 0x10d   :  { %698 = vst.msk [vmem:[%s1336_s4 + $0x44] sm:$0xf] %vm183_vm1, %v219_v55 }
 0x111   :  { %v221_v56 = vpop.permute.xlu1 %220 }
 0x112   :  { %699 = vst.msk [vmem:[%s1336_s4 + $0x48] sm:$0xf] %vm183_vm1, %v221_v56 }
 0x113   :  { %v403_v57 = vpop.permute.xlu2 %402  ;;  %v575_v58 = vpop.permute.xlu0 %574 }
 0x114   :  { %733 = vst.msk [vmem:[%s1337_s5 + $0x50] sm:$0xf] %vm183_vm1, %v403_v57 }
 0x115   :  { %762 = vst.msk [vmem:[%s1338_s6 + $0x44] sm:$0xf] %vm183_vm1, %v575_v58 }
 0x119   :  { %v577_v59 = vpop.permute.xlu1 %576 }
 0x11a   :  { %763 = vst.msk [vmem:[%s1338_s6 + $0x48] sm:$0xf] %vm183_vm1, %v577_v59 }
 0x11b   :  { %v227_v60 = vpop.permute.xlu2 %226  ;;  %v399_v61 = vpop.permute.xlu0 %398 }
 0x11c   :  { %702 = vst.msk [vmem:[%s1336_s4 + $0x54] sm:$0xf] %vm183_vm1, %v227_v60 }
 0x11d   :  { %731 = vst.msk [vmem:[%s1337_s5 + $0x48] sm:$0xf] %vm183_vm1, %v399_v61 }
 0x121   :  { %v223_v62 = vpop.permute.xlu1 %222 }
 0x122   :  { %700 = vst.msk [vmem:[%s1336_s4 + $0x4c] sm:$0xf] %vm183_vm1, %v223_v62 }
 0x123   :  { %v421_v63 = vpop.permute.xlu2 %420  ;;  %v247_v0 = vpop.permute.xlu0 %246 }
 0x124   :  { %742 = vst.msk [vmem:[%s1337_s5 + $0x74] sm:$0xf] %vm183_vm1, %v421_v63 }
 0x125   :  { %712 = vst.msk [vmem:[%s1336_s4 + $0x7c] sm:$0xf] %vm183_vm1, %v247_v0 }
 0x129   :  { %v401_v1 = vpop.permute.xlu1 %400 }
 0x12a   :  { %732 = vst.msk [vmem:[%s1337_s5 + $0x4c] sm:$0xf] %vm183_vm1, %v401_v1 }
 0x12b   :  { %v585_v2 = vpop.permute.xlu2 %584  ;;  %v581_v3 = vpop.permute.xlu0 %580 }
 0x12c   :  { %767 = vst.msk [vmem:[%s1338_s6 + $0x58] sm:$0xf] %vm183_vm1, %v585_v2 }
 0x12d   :  { %765 = vst.msk [vmem:[%s1338_s6 + $0x50] sm:$0xf] %vm183_vm1, %v581_v3 }
 0x131   :  { %v419_v4 = vpop.permute.xlu1 %418 }
 0x132   :  { %741 = vst.msk [vmem:[%s1337_s5 + $0x70] sm:$0xf] %vm183_vm1, %v419_v4 }
 0x133   :  { %v409_v5 = vpop.permute.xlu2 %408  ;;  %v405_v6 = vpop.permute.xlu0 %404 }
 0x134   :  { %736 = vst.msk [vmem:[%s1337_s5 + $0x5c] sm:$0xf] %vm183_vm1, %v409_v5 }
 0x135   :  { %734 = vst.msk [vmem:[%s1337_s5 + $0x54] sm:$0xf] %vm183_vm1, %v405_v6 }
 0x139   :  { %v583_v7 = vpop.permute.xlu1 %582 }
 0x13a   :  { %766 = vst.msk [vmem:[%s1338_s6 + $0x54] sm:$0xf] %vm183_vm1, %v583_v7 }
 0x13b   :  { %v233_v8 = vpop.permute.xlu2 %232  ;;  %v229_v9 = vpop.permute.xlu0 %228 }
 0x13c   :  { %705 = vst.msk [vmem:[%s1336_s4 + $0x60] sm:$0xf] %vm183_vm1, %v233_v8 }
 0x13d   :  { %703 = vst.msk [vmem:[%s1336_s4 + $0x58] sm:$0xf] %vm183_vm1, %v229_v9 }
 0x141   :  { %v407_v10 = vpop.permute.xlu1 %406 }
 0x142   :  { %735 = vst.msk [vmem:[%s1337_s5 + $0x58] sm:$0xf] %vm183_vm1, %v407_v10 }
 0x143   :  { %v597_v11 = vpop.permute.xlu2 %596  ;;  %v423_v12 = vpop.permute.xlu0 %422 }
 0x144   :  { %773 = vst.msk [vmem:[%s1338_s6 + $0x70] sm:$0xf] %vm183_vm1, %v597_v11 }
 0x145   :  { %743 = vst.msk [vmem:[%s1337_s5 + $0x78] sm:$0xf] %vm183_vm1, %v423_v12 }
 0x149   :  { %v231_v13 = vpop.permute.xlu1 %230 }
 0x14a   :  { %704 = vst.msk [vmem:[%s1336_s4 + $0x5c] sm:$0xf] %vm183_vm1, %v231_v13 }
 0x14b   :  { %v591_v14 = vpop.permute.xlu2 %590  ;;  %v587_v15 = vpop.permute.xlu0 %586 }
 0x14c   :  { %770 = vst.msk [vmem:[%s1338_s6 + $0x64] sm:$0xf] %vm183_vm1, %v591_v14 }
 0x14d   :  { %768 = vst.msk [vmem:[%s1338_s6 + $0x5c] sm:$0xf] %vm183_vm1, %v587_v15 }
 0x151   :  { %v425_v16 = vpop.permute.xlu1 %424 }
 0x152   :  { %744 = vst.msk [vmem:[%s1337_s5 + $0x7c] sm:$0xf] %vm183_vm1, %v425_v16 }
 0x153   :  { %v415_v17 = vpop.permute.xlu2 %414  ;;  %v411_v18 = vpop.permute.xlu0 %410 }
 0x154   :  { %739 = vst.msk [vmem:[%s1337_s5 + $0x68] sm:$0xf] %vm183_vm1, %v415_v17 }
 0x155   :  { %737 = vst.msk [vmem:[%s1337_s5 + $0x60] sm:$0xf] %vm183_vm1, %v411_v18 }
 0x159   :  { %v589_v19 = vpop.permute.xlu1 %588 }
 0x15a   :  { %769 = vst.msk [vmem:[%s1338_s6 + $0x60] sm:$0xf] %vm183_vm1, %v589_v19 }
 0x15b   :  { %v239_v20 = vpop.permute.xlu2 %238  ;;  %v235_v21 = vpop.permute.xlu0 %234 }
 0x15c   :  { %708 = vst.msk [vmem:[%s1336_s4 + $0x6c] sm:$0xf] %vm183_vm1, %v239_v20 }
 0x15d   :  { %706 = vst.msk [vmem:[%s1336_s4 + $0x64] sm:$0xf] %vm183_vm1, %v235_v21 }
 0x161   :  { %v413_v22 = vpop.permute.xlu1 %412 }
 0x162   :  { %738 = vst.msk [vmem:[%s1337_s5 + $0x64] sm:$0xf] %vm183_vm1, %v413_v22 }
 0x163   :  { %v603_v23 = vpop.permute.xlu2 %602  ;;  %v593_v24 = vpop.permute.xlu0 %592 }
 0x164   :  { %776 = vst.msk [vmem:[%s1338_s6 + $0x7c] sm:$0xf] %vm183_vm1, %v603_v23 }
 0x165   :  { %771 = vst.msk [vmem:[%s1338_s6 + $0x68] sm:$0xf] %vm183_vm1, %v593_v24 }
 0x169   :  { %v237_v25 = vpop.permute.xlu1 %236 }
 0x16a   :  { %707 = vst.msk [vmem:[%s1336_s4 + $0x68] sm:$0xf] %vm183_vm1, %v237_v25 }
 0x16b   :  { %v417_v26 = vpop.permute.xlu0 %416 }
 0x16c   :  { %740 = vst.msk [vmem:[%s1337_s5 + $0x6c] sm:$0xf] %vm183_vm1, %v417_v26 }
 0x171   :  { %v595_v27 = vpop.permute.xlu1 %594 }
 0x172   :  { %772 = vst.msk [vmem:[%s1338_s6 + $0x6c] sm:$0xf] %vm183_vm1, %v595_v27 }
 0x173   :  { %v599_v28 = vpop.permute.xlu0 %598 }
 0x174   :  { %774 = vst.msk [vmem:[%s1338_s6 + $0x74] sm:$0xf] %vm183_vm1, %v599_v28 }
 0x179   :  { %v601_v29 = vpop.permute.xlu1 %600 }
 0x17a   :  { %775 = vst.msk [vmem:[%s1338_s6 + $0x78] sm:$0xf] %vm183_vm1, %v601_v29 }

// kernel: tpu_custom_call.1
= control target key start
LH: loop header
LB: loop body
LE: loop exit
PB: predicated region body
PF: predicated region fallthrough
CT: control target
= control target key end

     0   :  { %vm93_vm0 = vcmask 261120   ;;  %vm183_vm1 = vcmask 125952   ;;  %s798_s24 = smov 112   ;;  %s1332_s1 = inlined_call_operand.vmem [shape: bf16[32,32], index: 1, kind: input, shape index: {}]   ;;  %s1333_s2 = inlined_call_operand.vmem [shape: bf16[32,32], index: 2, kind: input, shape index: {}]   ;;  %s1334_s3 = inlined_call_operand.vmem [shape: bf16[32,32], index: 3, kind: input, shape index: {}]   ;;  %s1335_s0 = inlined_call_operand.vmem [shape: bf16[128,32], index: 0, kind: input, shape index: {}]   ;;  %s1336_s4 = inlined_call_operand.vmem [shape: bf16[2,128,16], index: 4, kind: output, shape index: {0}]   ;;  %s1337_s5 = inlined_call_operand.vmem [shape: bf16[2,128,16], index: 5, kind: output, shape index: {1}]   ;;  %s1338_s6 = inlined_call_operand.vmem [shape: bf16[2,128,16], index: 6, kind: output, shape index: {2}]  }
   0x1   :  { %v786_v0 = vld [vmem:[%s1332_s1 + $0x8] sm:$0xff]  ;;  %v785_v3 = vld [vmem:[%s1332_s1] sm:$0xff]  ;;  %v783_v7 = vld [vmem:[%s1335_s0 + $0x30] sm:$0xff] }
   0x2   :  { %v788_v1 = vld [vmem:[%s1333_s2 + $0x8] sm:$0xff]  ;;  %124 = vmatpush.bf16.msra.mxu0 %v786_v0  ;;  %791 = vmatpush.bf16.msra.mxu3 %v786_v0  ;;  %v787_v4 = vld [vmem:[%s1333_s2] sm:$0xff]  ;;  %v784_v9 = vld [vmem:[%s1335_s0 + $0x38] sm:$0xff] }
   0x3   :  { %v790_v2 = vld [vmem:[%s1334_s3 + $0x8] sm:$0xff]  ;;  %303 = vmatpush.bf16.msra.mxu1 %v788_v1  ;;  %v789_v5 = vld [vmem:[%s1334_s3] sm:$0xff]  ;;  %v779_v10 = vld [vmem:[%s1335_s0 + $0x10] sm:$0xff] }
   0x4   :  { %481 = vmatpush.bf16.msra.mxu2 %v790_v2  ;;  %v777_v6 = vld [vmem:[%s1335_s0] sm:$0xff]  ;;  %v778_v8 = vld [vmem:[%s1335_s0 + $0x8] sm:$0xff]  ;;  %v780_v11 = vld [vmem:[%s1335_s0 + $0x18] sm:$0xff] }
   0x5   :  { %v781_v12 = vld [vmem:[%s1335_s0 + $0x20] sm:$0xff]  ;;  %v782_v13 = vld [vmem:[%s1335_s0 + $0x28] sm:$0xff] }
   0x6   :  { %125 = vmatpush.bf16.msra.mxu0 %v785_v3  ;;  %792 = vmatpush.bf16.msra.mxu3 %v785_v3 }
   0x7   :  { %304 = vmatpush.bf16.msra.mxu1 %v787_v4 }
   0x8   :  { %482 = vmatpush.bf16.msra.mxu2 %v789_v5 }
   0x9   :  { %689 = vmatmul.msk.bf16.vlgmr.msra.gmra.mxu0 %vm93_vm0, %v777_v6  ;;  %695 = vmatmul.msk.bf16.vlgmr.msra.gmra.mxu3 %vm93_vm0, %v783_v7 }
   0xa   :  { %793 = vmatpush.bf16.msrb.mxu3 %v788_v1  ;;  %721 = vmatmul.msk.bf16.vlgmr.msra.gmra.mxu1 %vm93_vm0, %v777_v6 }
   0xb   :  { %753 = vmatmul.msk.bf16.vlgmr.msra.gmra.mxu2 %vm93_vm0, %v777_v6 }
   0xe   :  { %794 = vmatpush.bf16.msrb.mxu3 %v787_v4 }
  0x12   :  { %795 = vmatpush.bf16.msra.mxu3 %v790_v2 }
  0x16   :  { %796 = vmatpush.bf16.msra.mxu3 %v789_v5 }
  0x19   :  { %690 = vmatmul.msk.bf16.gmra.mxu0 %vm93_vm0, %v778_v8  ;;  %696 = vmatmul.msk.bf16.gmra.mxu3 %vm93_vm0, %v784_v9 }
  0x1a   :  { %722 = vmatmul.msk.bf16.gmra.mxu1 %vm93_vm0, %v778_v8 }
  0x1b   :  { %754 = vmatmul.msk.bf16.gmra.mxu2 %vm93_vm0, %v778_v8 }
  0x29   :  { %691 = vmatmul.msk.bf16.gmra.mxu0 %vm93_vm0, %v779_v10  ;;  %727 = vmatmul.msk.bf16.vlgmr.msrb.gmra.mxu3 %vm93_vm0, %v783_v7 }
  0x2a   :  { %723 = vmatmul.msk.bf16.gmra.mxu1 %vm93_vm0, %v779_v10 }
  0x2b   :  { %755 = vmatmul.msk.bf16.gmra.mxu2 %vm93_vm0, %v779_v10 }
  0x39   :  { %692 = vmatmul.msk.bf16.gmra.mxu0 %vm93_vm0, %v780_v11  ;;  %728 = vmatmul.msk.bf16.gmra.mxu3 %vm93_vm0, %v784_v9 }
  0x3a   :  { %724 = vmatmul.msk.bf16.gmra.mxu1 %vm93_vm0, %v780_v11 }
  0x3b   :  { %756 = vmatmul.msk.bf16.gmra.mxu2 %vm93_vm0, %v780_v11 }
  0x49   :  { %693 = vmatmul.msk.bf16.gmra.mxu0 %vm93_vm0, %v781_v12  ;;  %759 = vmatmul.msk.bf16.vlgmr.msra.gmra.mxu3 %vm93_vm0, %v783_v7 }
  0x4a   :  { %725 = vmatmul.msk.bf16.gmra.mxu1 %vm93_vm0, %v781_v12 }
  0x4b   :  { %757 = vmatmul.msk.bf16.gmra.mxu2 %vm93_vm0, %v781_v12 }
  0x59   :  { %694 = vmatmul.msk.bf16.gmra.mxu0 %vm93_vm0, %v782_v13  ;;  %760 = vmatmul.msk.bf16.gmra.mxu3 %vm93_vm0, %v784_v9 }
  0x5a   :  { %726 = vmatmul.msk.bf16.gmra.mxu1 %vm93_vm0, %v782_v13 }
  0x5b   :  { %758 = vmatmul.msk.bf16.gmra.mxu2 %vm93_vm0, %v782_v13 }
  0x86   :  { %v127_v14 = vpop.f32.mrf.mxu0 }
  0x87   :  { %v167_v15 = vpack.c.bf16 %v127_v14, %v127_v14  ;;  %v306_v16 = vpop.f32.mrf.mxu1 }
  0x88   :  { %v346_v17 = vpack.c.bf16 %v306_v16, %v306_v16 }
  0x89   :  { %184 = vst.msk [vmem:[%s1336_s4] sm:$0xf] %vm183_vm1, %v167_v15  ;;  %216 = vrot.lane.b32.xlu0 %v167_v15, %s798_s24 }
  0x8a   :  { %362 = vst.msk [vmem:[%s1337_s5] sm:$0xf] %vm183_vm1, %v346_v17  ;;  %394 = vrot.lane.b32.xlu1 %v346_v17, %s798_s24 }
  0x8c   :  { %v157_v18 = vpop.f32.mrf.mxu3 }
  0x8d   :  { %v179_v19 = vpack.c.bf16 %v157_v18, %v157_v18 }
  0x8e   :  { %v484_v20 = vpop.f32.mrf.mxu2  ;;  %v129_v22 = vpop.f32.mrf.mxu0 }
  0x8f   :  { %v524_v21 = vpack.c.bf16 %v484_v20, %v484_v20  ;;  %196 = vst.msk [vmem:[%s1336_s4 + $0x30] sm:$0xf] %vm183_vm1, %v179_v19  ;;  %v168_v23 = vpack.c.bf16 %v129_v22, %v129_v22  ;;  %v308_v24 = vpop.f32.mrf.mxu1 }
  0x90   :  { %v347_v25 = vpack.c.bf16 %v308_v24, %v308_v24 }
  0x91   :  { %540 = vst.msk [vmem:[%s1338_s6] sm:$0xf] %vm183_vm1, %v524_v21  ;;  %572 = vrot.lane.b32.xlu2 %v524_v21, %s798_s24  ;;  %240 = vrot.lane.b32.xlu0 %v179_v19, %s798_s24 }
  0x92   :  { %185 = vst.msk [vmem:[%s1336_s4 + $0x4] sm:$0xf] %vm183_vm1, %v168_v23 }
  0x93   :  { %363 = vst.msk [vmem:[%s1337_s5 + $0x4] sm:$0xf] %vm183_vm1, %v347_v25 }
  0x94   :  { %v159_v26 = vpop.f32.mrf.mxu3 }
  0x95   :  { %v180_v27 = vpack.c.bf16 %v159_v26, %v159_v26 }
  0x96   :  { %v486_v28 = vpop.f32.mrf.mxu2  ;;  %v132_v30 = vpop.f32.mrf.mxu0 }
  0x97   :  { %v525_v29 = vpack.c.bf16 %v486_v28, %v486_v28  ;;  %197 = vst.msk [vmem:[%s1336_s4 + $0x34] sm:$0xf] %vm183_vm1, %v180_v27  ;;  %v169_v31 = vpack.c.bf16 %v132_v30, %v132_v30  ;;  %242 = vrot.lane.b32.xlu1 %v180_v27, %s798_s24  ;;  %v311_v32 = vpop.f32.mrf.mxu1 }
  0x98   :  { %v348_v33 = vpack.c.bf16 %v311_v32, %v311_v32 }
  0x99   :  { %541 = vst.msk [vmem:[%s1338_s6 + $0x4] sm:$0xf] %vm183_vm1, %v525_v29  ;;  %396 = vrot.lane.b32.xlu2 %v347_v25, %s798_s24  ;;  %218 = vrot.lane.b32.xlu0 %v168_v23, %s798_s24 }
  0x9a   :  { %186 = vst.msk [vmem:[%s1336_s4 + $0x8] sm:$0xf] %vm183_vm1, %v169_v31 }
  0x9b   :  { %364 = vst.msk [vmem:[%s1337_s5 + $0x8] sm:$0xf] %vm183_vm1, %v348_v33 }
  0x9c   :  { %v162_v34 = vpop.f32.mrf.mxu3 }
  0x9d   :  { %v181_v35 = vpack.c.bf16 %v162_v34, %v162_v34 }
  0x9e   :  { %v489_v36 = vpop.f32.mrf.mxu2  ;;  %v134_v38 = vpop.f32.mrf.mxu0 }
  0x9f   :  { %v526_v37 = vpack.c.bf16 %v489_v36, %v489_v36  ;;  %198 = vst.msk [vmem:[%s1336_s4 + $0x38] sm:$0xf] %vm183_vm1, %v181_v35  ;;  %v170_v39 = vpack.c.bf16 %v134_v38, %v134_v38  ;;  %220 = vrot.lane.b32.xlu1 %v169_v31, %s798_s24  ;;  %v313_v40 = vpop.f32.mrf.mxu1 }
  0xa0   :  { %v349_v41 = vpack.c.bf16 %v313_v40, %v313_v40 }
  0xa1   :  { %542 = vst.msk [vmem:[%s1338_s6 + $0x8] sm:$0xf] %vm183_vm1, %v526_v37  ;;  %244 = vrot.lane.b32.xlu2 %v181_v35, %s798_s24  ;;  %574 = vrot.lane.b32.xlu0 %v525_v29, %s798_s24 }
  0xa2   :  { %187 = vst.msk [vmem:[%s1336_s4 + $0xc] sm:$0xf] %vm183_vm1, %v170_v39 }
  0xa3   :  { %365 = vst.msk [vmem:[%s1337_s5 + $0xc] sm:$0xf] %vm183_vm1, %v349_v41 }
  0xa4   :  { %v164_v42 = vpop.f32.mrf.mxu3 }
  0xa5   :  { %v182_v44 = vpack.c.bf16 %v164_v42, %v164_v42 }
  0xa6   :  { %v491_v43 = vpop.f32.mrf.mxu2  ;;  %v137_v46 = vpop.f32.mrf.mxu0 }
  0xa7   :  { %v527_v45 = vpack.c.bf16 %v491_v43, %v491_v43  ;;  %576 = vrot.lane.b32.xlu1 %v526_v37, %s798_s24  ;;  %v171_v47 = vpack.c.bf16 %v137_v46, %v137_v46  ;;  %199 = vst.msk [vmem:[%s1336_s4 + $0x3c] sm:$0xf] %vm183_vm1, %v182_v44  ;;  %v316_v48 = vpop.f32.mrf.mxu1 }
  0xa8   :  { %v350_v49 = vpack.c.bf16 %v316_v48, %v316_v48 }
  0xa9   :  { %543 = vst.msk [vmem:[%s1338_s6 + $0xc] sm:$0xf] %vm183_vm1, %v527_v45  ;;  %578 = vrot.lane.b32.xlu2 %v527_v45, %s798_s24  ;;  %398 = vrot.lane.b32.xlu0 %v348_v33, %s798_s24 }
  0xaa   :  { %188 = vst.msk [vmem:[%s1336_s4 + $0x10] sm:$0xf] %vm183_vm1, %v171_v47 }
  0xab   :  { %366 = vst.msk [vmem:[%s1337_s5 + $0x10] sm:$0xf] %vm183_vm1, %v350_v49 }
  0xac   :  { %v336_v50 = vpop.f32.mrf.mxu3 }
  0xad   :  { %v358_v51 = vpack.c.bf16 %v336_v50, %v336_v50 }
  0xae   :  { %v494_v52 = vpop.f32.mrf.mxu2  ;;  %v139_v54 = vpop.f32.mrf.mxu0 }
  0xaf   :  { %v528_v53 = vpack.c.bf16 %v494_v52, %v494_v52  ;;  %222 = vrot.lane.b32.xlu1 %v170_v39, %s798_s24  ;;  %374 = vst.msk [vmem:[%s1337_s5 + $0x30] sm:$0xf] %vm183_vm1, %v358_v51  ;;  %v172_v55 = vpack.c.bf16 %v139_v54, %v139_v54  ;;  %v318_v56 = vpop.f32.mrf.mxu1 }
  0xb0   :  { %v351_v57 = vpack.c.bf16 %v318_v56, %v318_v56 }
  0xb1   :  { %224 = vrot.lane.b32.xlu2 %v171_v47, %s798_s24  ;;  %544 = vst.msk [vmem:[%s1338_s6 + $0x10] sm:$0xf] %vm183_vm1, %v528_v53  ;;  %246 = vrot.lane.b32.xlu0 %v182_v44, %s798_s24 }
  0xb2   :  { %189 = vst.msk [vmem:[%s1336_s4 + $0x14] sm:$0xf] %vm183_vm1, %v172_v55 }
  0xb3   :  { %367 = vst.msk [vmem:[%s1337_s5 + $0x14] sm:$0xf] %vm183_vm1, %v351_v57 }
  0xb4   :  { %v338_v58 = vpop.f32.mrf.mxu3 }
  0xb5   :  { %v359_v59 = vpack.c.bf16 %v338_v58, %v338_v58 }
  0xb6   :  { %v496_v60 = vpop.f32.mrf.mxu2  ;;  %v142_v62 = vpop.f32.mrf.mxu0 }
  0xb7   :  { %v529_v61 = vpack.c.bf16 %v496_v60, %v496_v60  ;;  %400 = vrot.lane.b32.xlu1 %v349_v41, %s798_s24  ;;  %375 = vst.msk [vmem:[%s1337_s5 + $0x34] sm:$0xf] %vm183_vm1, %v359_v59  ;;  %v173_v63 = vpack.c.bf16 %v142_v62, %v142_v62  ;;  %v321_v0 = vpop.f32.mrf.mxu1 }
  0xb8   :  { %v352_v1 = vpack.c.bf16 %v321_v0, %v321_v0 }
  0xb9   :  { %402 = vrot.lane.b32.xlu2 %v350_v49, %s798_s24  ;;  %545 = vst.msk [vmem:[%s1338_s6 + $0x14] sm:$0xf] %vm183_vm1, %v529_v61  ;;  %580 = vrot.lane.b32.xlu0 %v528_v53, %s798_s24 }
  0xba   :  { %190 = vst.msk [vmem:[%s1336_s4 + $0x18] sm:$0xf] %vm183_vm1, %v173_v63 }
  0xbb   :  { %368 = vst.msk [vmem:[%s1337_s5 + $0x18] sm:$0xf] %vm183_vm1, %v352_v1 }
  0xbc   :  { %v341_v2 = vpop.f32.mrf.mxu3 }
  0xbd   :  { %v360_v3 = vpack.c.bf16 %v341_v2, %v341_v2 }
  0xbe   :  { %v499_v4 = vpop.f32.mrf.mxu2  ;;  %v144_v5 = vpop.f32.mrf.mxu0 }
  0xbf   :  { %v530_v6 = vpack.c.bf16 %v499_v4, %v499_v4  ;;  %418 = vrot.lane.b32.xlu1 %v358_v51, %s798_s24  ;;  %v174_v7 = vpack.c.bf16 %v144_v5, %v144_v5  ;;  %v323_v8 = vpop.f32.mrf.mxu1  ;;  %376 = vst.msk [vmem:[%s1337_s5 + $0x38] sm:$0xf] %vm183_vm1, %v360_v3 }
  0xc0   :  { %v353_v9 = vpack.c.bf16 %v323_v8, %v323_v8 }
  0xc1   :  { %226 = vrot.lane.b32.xlu2 %v172_v55, %s798_s24  ;;  %546 = vst.msk [vmem:[%s1338_s6 + $0x18] sm:$0xf] %vm183_vm1, %v530_v6  ;;  %404 = vrot.lane.b32.xlu0 %v351_v57, %s798_s24 }
  0xc2   :  { %191 = vst.msk [vmem:[%s1336_s4 + $0x1c] sm:$0xf] %vm183_vm1, %v174_v7 }
  0xc3   :  { %369 = vst.msk [vmem:[%s1337_s5 + $0x1c] sm:$0xf] %vm183_vm1, %v353_v9 }
  0xc4   :  { %v343_v10 = vpop.f32.mrf.mxu3 }
  0xc5   :  { %v361_v11 = vpack.c.bf16 %v343_v10, %v343_v10 }
  0xc6   :  { %v501_v12 = vpop.f32.mrf.mxu2  ;;  %v147_v14 = vpop.f32.mrf.mxu0 }
  0xc7   :  { %v531_v13 = vpack.c.bf16 %v501_v12, %v501_v12  ;;  %582 = vrot.lane.b32.xlu1 %v529_v61, %s798_s24  ;;  %377 = vst.msk [vmem:[%s1337_s5 + $0x3c] sm:$0xf] %vm183_vm1, %v361_v11  ;;  %v175_v15 = vpack.c.bf16 %v147_v14, %v147_v14  ;;  %v326_v16 = vpop.f32.mrf.mxu1 }
  0xc8   :  { %v354_v17 = vpack.c.bf16 %v326_v16, %v326_v16 }
  0xc9   :  { %420 = vrot.lane.b32.xlu2 %v359_v59, %s798_s24  ;;  %547 = vst.msk [vmem:[%s1338_s6 + $0x1c] sm:$0xf] %vm183_vm1, %v531_v13  ;;  %228 = vrot.lane.b32.xlu0 %v173_v63, %s798_s24 }
  0xca   :  { %192 = vst.msk [vmem:[%s1336_s4 + $0x20] sm:$0xf] %vm183_vm1, %v175_v15 }
  0xcb   :  { %370 = vst.msk [vmem:[%s1337_s5 + $0x20] sm:$0xf] %vm183_vm1, %v354_v17 }
  0xcc   :  { %v514_v18 = vpop.f32.mrf.mxu3 }
  0xcd   :  { %v536_v20 = vpack.c.bf16 %v514_v18, %v514_v18 }
  0xce   :  { %v504_v19 = vpop.f32.mrf.mxu2  ;;  %v149_v22 = vpop.f32.mrf.mxu0 }
  0xcf   :  { %v532_v21 = vpack.c.bf16 %v504_v19, %v504_v19  ;;  %406 = vrot.lane.b32.xlu1 %v352_v1, %s798_s24  ;;  %v176_v23 = vpack.c.bf16 %v149_v22, %v149_v22  ;;  %v328_v24 = vpop.f32.mrf.mxu1  ;;  %552 = vst.msk [vmem:[%s1338_s6 + $0x30] sm:$0xf] %vm183_vm1, %v536_v20 }
  0xd0   :  { %v355_v25 = vpack.c.bf16 %v328_v24, %v328_v24 }
  0xd1   :  { %584 = vrot.lane.b32.xlu2 %v530_v6, %s798_s24  ;;  %548 = vst.msk [vmem:[%s1338_s6 + $0x20] sm:$0xf] %vm183_vm1, %v532_v21  ;;  %422 = vrot.lane.b32.xlu0 %v360_v3, %s798_s24 }
  0xd2   :  { %193 = vst.msk [vmem:[%s1336_s4 + $0x24] sm:$0xf] %vm183_vm1, %v176_v23 }
  0xd3   :  { %371 = vst.msk [vmem:[%s1337_s5 + $0x24] sm:$0xf] %vm183_vm1, %v355_v25 }
  0xd4   :  { %v516_v26 = vpop.f32.mrf.mxu3 }
  0xd5   :  { %v537_v28 = vpack.c.bf16 %v516_v26, %v516_v26 }
  0xd6   :  { %v506_v27 = vpop.f32.mrf.mxu2  ;;  %v152_v30 = vpop.f32.mrf.mxu0 }
  0xd7   :  { %v533_v29 = vpack.c.bf16 %v506_v27, %v506_v27  ;;  %230 = vrot.lane.b32.xlu1 %v174_v7, %s798_s24  ;;  %v177_v31 = vpack.c.bf16 %v152_v30, %v152_v30  ;;  %v331_v32 = vpop.f32.mrf.mxu1  ;;  %553 = vst.msk [vmem:[%s1338_s6 + $0x34] sm:$0xf] %vm183_vm1, %v537_v28 }
  0xd8   :  { %v356_v33 = vpack.c.bf16 %v331_v32, %v331_v32 }
  0xd9   :  { %408 = vrot.lane.b32.xlu2 %v353_v9, %s798_s24  ;;  %549 = vst.msk [vmem:[%s1338_s6 + $0x24] sm:$0xf] %vm183_vm1, %v533_v29  ;;  %586 = vrot.lane.b32.xlu0 %v531_v13, %s798_s24 }
  0xda   :  { %194 = vst.msk [vmem:[%s1336_s4 + $0x28] sm:$0xf] %vm183_vm1, %v177_v31 }
  0xdb   :  { %372 = vst.msk [vmem:[%s1337_s5 + $0x28] sm:$0xf] %vm183_vm1, %v356_v33 }
  0xdc   :  { %v519_v34 = vpop.f32.mrf.mxu3 }
  0xdd   :  { %v538_v36 = vpack.c.bf16 %v519_v34, %v519_v34 }
  0xde   :  { %v509_v35 = vpop.f32.mrf.mxu2  ;;  %v154_v38 = vpop.f32.mrf.mxu0 }
  0xdf   :  { %v534_v37 = vpack.c.bf16 %v509_v35, %v509_v35  ;;  %424 = vrot.lane.b32.xlu1 %v361_v11, %s798_s24  ;;  %v178_v39 = vpack.c.bf16 %v154_v38, %v154_v38  ;;  %v333_v40 = vpop.f32.mrf.mxu1  ;;  %554 = vst.msk [vmem:[%s1338_s6 + $0x38] sm:$0xf] %vm183_vm1, %v538_v36 }
  0xe0   :  { %v357_v41 = vpack.c.bf16 %v333_v40, %v333_v40 }
  0xe1   :  { %232 = vrot.lane.b32.xlu2 %v175_v15, %s798_s24  ;;  %550 = vst.msk [vmem:[%s1338_s6 + $0x28] sm:$0xf] %vm183_vm1, %v534_v37  ;;  %410 = vrot.lane.b32.xlu0 %v354_v17, %s798_s24 }
  0xe2   :  { %195 = vst.msk [vmem:[%s1336_s4 + $0x2c] sm:$0xf] %vm183_vm1, %v178_v39 }
  0xe3   :  { %373 = vst.msk [vmem:[%s1337_s5 + $0x2c] sm:$0xf] %vm183_vm1, %v357_v41 }
  0xe4   :  { %v521_v42 = vpop.f32.mrf.mxu3 }
  0xe5   :  { %v539_v44 = vpack.c.bf16 %v521_v42, %v521_v42 }
  0xe6   :  { %v511_v43 = vpop.f32.mrf.mxu2 }
  0xe7   :  { %v535_v45 = vpack.c.bf16 %v511_v43, %v511_v43  ;;  %588 = vrot.lane.b32.xlu1 %v532_v21, %s798_s24  ;;  %555 = vst.msk [vmem:[%s1338_s6 + $0x3c] sm:$0xf] %vm183_vm1, %v539_v44 }
  0xe9   :  { %596 = vrot.lane.b32.xlu2 %v536_v20, %s798_s24  ;;  %551 = vst.msk [vmem:[%s1338_s6 + $0x2c] sm:$0xf] %vm183_vm1, %v535_v45  ;;  %234 = vrot.lane.b32.xlu0 %v176_v23, %s798_s24 }
  0xeb   :  { %v573_v46 = vpop.permute.xlu2 %572 }
  0xec   :  { %761 = vst.msk [vmem:[%s1338_s6 + $0x40] sm:$0xf] %vm183_vm1, %v573_v46 }
  0xef   :  { %412 = vrot.lane.b32.xlu1 %v355_v25, %s798_s24 }
  0xf1   :  { %590 = vrot.lane.b32.xlu2 %v533_v29, %s798_s24  ;;  %592 = vrot.lane.b32.xlu0 %v534_v37, %s798_s24 }
  0xf3   :  { %v397_v47 = vpop.permute.xlu2 %396 }
  0xf4   :  { %730 = vst.msk [vmem:[%s1337_s5 + $0x44] sm:$0xf] %vm183_vm1, %v397_v47 }
  0xf7   :  { %236 = vrot.lane.b32.xlu1 %v177_v31, %s798_s24 }
  0xf9   :  { %414 = vrot.lane.b32.xlu2 %v356_v33, %s798_s24  ;;  %416 = vrot.lane.b32.xlu0 %v357_v41, %s798_s24 }
  0xfb   :  { %v245_v48 = vpop.permute.xlu2 %244  ;;  %v217_v49 = vpop.permute.xlu0 %216 }
  0xfc   :  { %711 = vst.msk [vmem:[%s1336_s4 + $0x78] sm:$0xf] %vm183_vm1, %v245_v48  ;;  %v395_v50 = vpop.permute.xlu1 %394 }
  0xfd   :  { %697 = vst.msk [vmem:[%s1336_s4 + $0x40] sm:$0xf] %vm183_vm1, %v217_v49 }
  0xfe   :  { %729 = vst.msk [vmem:[%s1337_s5 + $0x40] sm:$0xf] %vm183_vm1, %v395_v50 }
  0xff   :  { %594 = vrot.lane.b32.xlu1 %v535_v45, %s798_s24 }
 0x101   :  { %238 = vrot.lane.b32.xlu2 %v178_v39, %s798_s24  ;;  %598 = vrot.lane.b32.xlu0 %v537_v28, %s798_s24 }
 0x103   :  { %v579_v51 = vpop.permute.xlu2 %578  ;;  %v241_v52 = vpop.permute.xlu0 %240 }
 0x104   :  { %764 = vst.msk [vmem:[%s1338_s6 + $0x4c] sm:$0xf] %vm183_vm1, %v579_v51 }
 0x105   :  { %709 = vst.msk [vmem:[%s1336_s4 + $0x70] sm:$0xf] %vm183_vm1, %v241_v52 }
 0x107   :  { %600 = vrot.lane.b32.xlu1 %v538_v36, %s798_s24 }
 0x109   :  { %602 = vrot.lane.b32.xlu2 %v539_v44, %s798_s24  ;;  %v243_v53 = vpop.permute.xlu1 %242 }
 0x10a   :  { %710 = vst.msk [vmem:[%s1336_s4 + $0x74] sm:$0xf] %vm183_vm1, %v243_v53 }
 0x10b   :  { %v225_v54 = vpop.permute.xlu2 %224  ;;  %v219_v55 = vpop.permute.xlu0 %218 }
 0x10c   :  { %701 = vst.msk [vmem:[%s1336_s4 + $0x50] sm:$0xf] %vm183_vm1, %v225_v54 }
 0x10d   :  { %698 = vst.msk [vmem:[%s1336_s4 + $0x44] sm:$0xf] %vm183_vm1, %v219_v55 }
 0x111   :  { %v221_v56 = vpop.permute.xlu1 %220 }
 0x112   :  { %699 = vst.msk [vmem:[%s1336_s4 + $0x48] sm:$0xf] %vm183_vm1, %v221_v56 }
 0x113   :  { %v403_v57 = vpop.permute.xlu2 %402  ;;  %v575_v58 = vpop.permute.xlu0 %574 }
 0x114   :  { %733 = vst.msk [vmem:[%s1337_s5 + $0x50] sm:$0xf] %vm183_vm1, %v403_v57 }
 0x115   :  { %762 = vst.msk [vmem:[%s1338_s6 + $0x44] sm:$0xf] %vm183_vm1, %v575_v58 }
 0x119   :  { %v577_v59 = vpop.permute.xlu1 %576 }
 0x11a   :  { %763 = vst.msk [vmem:[%s1338_s6 + $0x48] sm:$0xf] %vm183_vm1, %v577_v59 }
 0x11b   :  { %v227_v60 = vpop.permute.xlu2 %226  ;;  %v399_v61 = vpop.permute.xlu0 %398 }
 0x11c   :  { %702 = vst.msk [vmem:[%s1336_s4 + $0x54] sm:$0xf] %vm183_vm1, %v227_v60 }
 0x11d   :  { %731 = vst.msk [vmem:[%s1337_s5 + $0x48] sm:$0xf] %vm183_vm1, %v399_v61 }
 0x121   :  { %v223_v62 = vpop.permute.xlu1 %222 }
 0x122   :  { %700 = vst.msk [vmem:[%s1336_s4 + $0x4c] sm:$0xf] %vm183_vm1, %v223_v62 }
 0x123   :  { %v421_v63 = vpop.permute.xlu2 %420  ;;  %v247_v0 = vpop.permute.xlu0 %246 }
 0x124   :  { %742 = vst.msk [vmem:[%s1337_s5 + $0x74] sm:$0xf] %vm183_vm1, %v421_v63 }
 0x125   :  { %712 = vst.msk [vmem:[%s1336_s4 + $0x7c] sm:$0xf] %vm183_vm1, %v247_v0 }
 0x129   :  { %v401_v1 = vpop.permute.xlu1 %400 }
 0x12a   :  { %732 = vst.msk [vmem:[%s1337_s5 + $0x4c] sm:$0xf] %vm183_vm1, %v401_v1 }
 0x12b   :  { %v585_v2 = vpop.permute.xlu2 %584  ;;  %v581_v3 = vpop.permute.xlu0 %580 }
 0x12c   :  { %767 = vst.msk [vmem:[%s1338_s6 + $0x58] sm:$0xf] %vm183_vm1, %v585_v2 }
 0x12d   :  { %765 = vst.msk [vmem:[%s1338_s6 + $0x50] sm:$0xf] %vm183_vm1, %v581_v3 }
 0x131   :  { %v419_v4 = vpop.permute.xlu1 %418 }
 0x132   :  { %741 = vst.msk [vmem:[%s1337_s5 + $0x70] sm:$0xf] %vm183_vm1, %v419_v4 }
 0x133   :  { %v409_v5 = vpop.permute.xlu2 %408  ;;  %v405_v6 = vpop.permute.xlu0 %404 }
 0x134   :  { %736 = vst.msk [vmem:[%s1337_s5 + $0x5c] sm:$0xf] %vm183_vm1, %v409_v5 }
 0x135   :  { %734 = vst.msk [vmem:[%s1337_s5 + $0x54] sm:$0xf] %vm183_vm1, %v405_v6 }
 0x139   :  { %v583_v7 = vpop.permute.xlu1 %582 }
 0x13a   :  { %766 = vst.msk [vmem:[%s1338_s6 + $0x54] sm:$0xf] %vm183_vm1, %v583_v7 }
 0x13b   :  { %v233_v8 = vpop.permute.xlu2 %232  ;;  %v229_v9 = vpop.permute.xlu0 %228 }
 0x13c   :  { %705 = vst.msk [vmem:[%s1336_s4 + $0x60] sm:$0xf] %vm183_vm1, %v233_v8 }
 0x13d   :  { %703 = vst.msk [vmem:[%s1336_s4 + $0x58] sm:$0xf] %vm183_vm1, %v229_v9 }
 0x141   :  { %v407_v10 = vpop.permute.xlu1 %406 }
 0x142   :  { %735 = vst.msk [vmem:[%s1337_s5 + $0x58] sm:$0xf] %vm183_vm1, %v407_v10 }
 0x143   :  { %v597_v11 = vpop.permute.xlu2 %596  ;;  %v423_v12 = vpop.permute.xlu0 %422 }
 0x144   :  { %773 = vst.msk [vmem:[%s1338_s6 + $0x70] sm:$0xf] %vm183_vm1, %v597_v11 }
 0x145   :  { %743 = vst.msk [vmem:[%s1337_s5 + $0x78] sm:$0xf] %vm183_vm1, %v423_v12 }
 0x149   :  { %v231_v13 = vpop.permute.xlu1 %230 }
 0x14a   :  { %704 = vst.msk [vmem:[%s1336_s4 + $0x5c] sm:$0xf] %vm183_vm1, %v231_v13 }
 0x14b   :  { %v591_v14 = vpop.permute.xlu2 %590  ;;  %v587_v15 = vpop.permute.xlu0 %586 }
 0x14c   :  { %770 = vst.msk [vmem:[%s1338_s6 + $0x64] sm:$0xf] %vm183_vm1, %v591_v14 }
 0x14d   :  { %768 = vst.msk [vmem:[%s1338_s6 + $0x5c] sm:$0xf] %vm183_vm1, %v587_v15 }
 0x151   :  { %v425_v16 = vpop.permute.xlu1 %424 }
 0x152   :  { %744 = vst.msk [vmem:[%s1337_s5 + $0x7c] sm:$0xf] %vm183_vm1, %v425_v16 }
 0x153   :  { %v415_v17 = vpop.permute.xlu2 %414  ;;  %v411_v18 = vpop.permute.xlu0 %410 }
 0x154   :  { %739 = vst.msk [vmem:[%s1337_s5 + $0x68] sm:$0xf] %vm183_vm1, %v415_v17 }
 0x155   :  { %737 = vst.msk [vmem:[%s1337_s5 + $0x60] sm:$0xf] %vm183_vm1, %v411_v18 }
 0x159   :  { %v589_v19 = vpop.permute.xlu1 %588 }
 0x15a   :  { %769 = vst.msk [vmem:[%s1338_s6 + $0x60] sm:$0xf] %vm183_vm1, %v589_v19 }
 0x15b   :  { %v239_v20 = vpop.permute.xlu2 %238  ;;  %v235_v21 = vpop.permute.xlu0 %234 }
 0x15c   :  { %708 = vst.msk [vmem:[%s1336_s4 + $0x6c] sm:$0xf] %vm183_vm1, %v239_v20 }
 0x15d   :  { %706 = vst.msk [vmem:[%s1336_s4 + $0x64] sm:$0xf] %vm183_vm1, %v235_v21 }
 0x161   :  { %v413_v22 = vpop.permute.xlu1 %412 }
 0x162   :  { %738 = vst.msk [vmem:[%s1337_s5 + $0x64] sm:$0xf] %vm183_vm1, %v413_v22 }
 0x163   :  { %v603_v23 = vpop.permute.xlu2 %602  ;;  %v593_v24 = vpop.permute.xlu0 %592 }
 0x164   :  { %776 = vst.msk [vmem:[%s1338_s6 + $0x7c] sm:$0xf] %vm183_vm1, %v603_v23 }
 0x165   :  { %771 = vst.msk [vmem:[%s1338_s6 + $0x68] sm:$0xf] %vm183_vm1, %v593_v24 }
 0x169   :  { %v237_v25 = vpop.permute.xlu1 %236 }
 0x16a   :  { %707 = vst.msk [vmem:[%s1336_s4 + $0x68] sm:$0xf] %vm183_vm1, %v237_v25 }
 0x16b   :  { %v417_v26 = vpop.permute.xlu0 %416 }
 0x16c   :  { %740 = vst.msk [vmem:[%s1337_s5 + $0x6c] sm:$0xf] %vm183_vm1, %v417_v26 }
 0x171   :  { %v595_v27 = vpop.permute.xlu1 %594 }
 0x172   :  { %772 = vst.msk [vmem:[%s1338_s6 + $0x6c] sm:$0xf] %vm183_vm1, %v595_v27 }
 0x173   :  { %v599_v28 = vpop.permute.xlu0 %598 }
 0x174   :  { %774 = vst.msk [vmem:[%s1338_s6 + $0x74] sm:$0xf] %vm183_vm1, %v599_v28 }
 0x179   :  { %v601_v29 = vpop.permute.xlu1 %600 }
 0x17a   :  { %775 = vst.msk [vmem:[%s1338_s6 + $0x78] sm:$0xf] %vm183_vm1, %v601_v29 }

</bundles_post_ra>
